<compile_context>
chip_gen: v5e
topology: v5e:2x2
jax: 0.10.0
libtpu: 0.0.40
codegen_flags: <defaults>
</compile_context>

<pallas_src>
import math

import numpy as np
import jax
import jax.numpy as jnp
from jax.experimental import pallas as pl
from jax.experimental.pallas import tpu as pltpu

# ---------------- model hyper-parameters (small, consistent with module) -----
B = 2           # batch
N = 8           # sequence length (tokens)
DIM = 32        # embedding dim
DEPTH = 2       # number of transformer layers
HEADS = 4
DIM_HEAD = 8                     # constructor arg (only used for inner_dim & scale!)
MLP_DIM = 64
INNER = DIM * DIM_HEAD           # = 256  (reference module's inner_dim)
DH = INNER // HEADS              # = 64   (actual per-head width)
SCALE = DIM_HEAD ** (-0.5)       # reference uses dim_head**-0.5
LN_EPS = 1e-5
BT = B * N                       # flattened token count
_GELU_C = math.sqrt(2.0 / math.pi)
_NEG_BIG = -1e30                 # finite "minus infinity" for the batch mask


# ---------------------------- shared math ------------------------------------
def _layernorm(x, g, b):
    mu = jnp.mean(x, axis=-1, keepdims=True)
    var = jnp.mean((x - mu) ** 2, axis=-1, keepdims=True)
    return (x - mu) * jax.lax.rsqrt(var + LN_EPS) * g + b


def _gelu_tanh(x):
    # tanh-approx GELU: transcendental goes to the EUP slot.
    # (Reference uses exact erf GELU; difference is <1e-5 at these magnitudes.)
    return 0.5 * x * (1.0 + jnp.tanh(_GELU_C * (x + 0.044715 * x * x * x)))


# ---------------------------- Pallas kernel ----------------------------------
def transformer_kernel(
    x_ref,                      # (BT, DIM)                 f32
    bias_ref,                   # (1, BT, BT)               f32  block-diag batch bias (0 / -1e30)
    g1_ref, b1_ref,             # (DEPTH, 1, DIM)           f32  LayerNorm before attention
    wqkv_ref,                   # (DEPTH, HEADS, DIM, 3*DH) bf16 [Wq*scale | Wk | Wv] per head
    wo_ref,                     # (DEPTH, HEADS, DH, DIM)   bf16 per-head output projection
    bo_ref,                     # (DEPTH, 1, DIM)           f32
    g2_ref, b2_ref,             # (DEPTH, 1, DIM)           f32  LayerNorm before MLP
    w1_ref,                     # (DEPTH, DIM, MLP_DIM)     bf16
    bf1_ref,                    # (DEPTH, 1, MLP_DIM)       f32
    w2_ref,                     # (DEPTH, MLP_DIM, DIM)     bf16
    bf2_ref,                    # (DEPTH, 1, DIM)           f32
    o_ref,                      # (BT, DIM)                 f32
):
    x = x_ref[...]                                            # (BT, DIM) f32
    bias = bias_ref[...]                                      # (1, BT, BT) f32, hoisted

    for l in range(DEPTH):                                    # layers unrolled in-kernel
        # ---------------- attention block (PreNorm) ----------------
        xn = _layernorm(x, g1_ref[l], b1_ref[l])              # f32
        xnb = xn.astype(jnp.bfloat16)
        xh = jnp.broadcast_to(xnb[None], (HEADS, BT, DIM))    # (H, BT, DIM) bf16

        # One batched matmul for all heads x {Q, K, V}.  Scale folded into Wq.
        qkv = jnp.einsum("hnc,hcd->hnd", xh, wqkv_ref[l],
                         preferred_element_type=jnp.float32)  # (H, BT, 3*DH) f32
        q = qkv[..., :DH].astype(jnp.bfloat16)                # (H, BT, DH)
        k = qkv[..., DH:2 * DH].astype(jnp.bfloat16)
        v = qkv[..., 2 * DH:].astype(jnp.bfloat16)

        # Fold output projection into V (one batched dot): (attn@v)@Wo == attn@(v@Wo)
        vwo = jnp.einsum("hnd,hdc->hnc", v, wo_ref[l],
                         preferred_element_type=jnp.float32)  # (H, BT, DIM) f32

        # Batched attention over heads on the flattened token axis; cross-batch
        # logits are killed by the additive block-diagonal bias.
        dots = jnp.einsum("hnd,hmd->hnm", q, k,
                          preferred_element_type=jnp.float32)  # (H, BT, BT)
        dots = dots + bias                                     # mask cross-batch tokens
        dots = dots - jnp.max(dots, axis=-1, keepdims=True)
        e = jnp.exp(dots)
        attn = e * pl.reciprocal(jnp.sum(e, axis=-1, keepdims=True), approx=True)

        att = jnp.einsum("hnm,hmd->hnd", attn.astype(jnp.bfloat16),
                         vwo.astype(jnp.bfloat16),
                         preferred_element_type=jnp.float32)   # (H, BT, DIM)
        x = x + jnp.sum(att, axis=0) + bo_ref[l]               # head-sum + residual

        # ---------------- feed-forward block (PreNorm) ----------------
        xn2 = _layernorm(x, g2_ref[l], b2_ref[l])
        h1 = jnp.dot(xn2.astype(jnp.bfloat16), w1_ref[l],
                     preferred_element_type=jnp.float32) + bf1_ref[l]
        h1 = _gelu_tanh(h1)
        y = jnp.dot(h1.astype(jnp.bfloat16), w2_ref[l],
                    preferred_element_type=jnp.float32) + bf2_ref[l]
        x = x + y                                              # residual

    o_ref[...] = x


# ---------------------------- wrapper -----------------------------------------
def _full_spec(shape):
    nd = len(shape)
    return pl.BlockSpec(shape, lambda i, _nd=nd: (0,) * _nd)


def _make_attn_bias():
    """(1, BT, BT) additive bias: 0 within the same batch element, -1e30 across."""
    bid = np.arange(BT) // N
    m = bid[:, None] == bid[None, :]
    return jnp.asarray(np.where(m, 0.0, _NEG_BIG), dtype=jnp.float32).reshape(1, BT, BT)


def _cost_estimate(args, out_nbytes):
    flops_per_layer = 2 * (
        HEADS * BT * DIM * 3 * DH     # fused QKV
        + HEADS * BT * DH * DIM       # v @ Wo fold
        + HEADS * BT * BT * DH        # q @ k^T
        + HEADS * BT * BT * DIM       # attn @ (v@Wo)
        + BT * DIM * MLP_DIM          # MLP in
        + BT * MLP_DIM * DIM          # MLP out
    )
    transcendentals = DEPTH * (HEADS * BT * BT + BT * MLP_DIM)   # exp + tanh
    bytes_accessed = int(sum(int(np.prod(a.shape)) * a.dtype.itemsize for a in args)
                         + out_nbytes)
    return pl.CostEstimate(flops=DEPTH * flops_per_layer,
                           transcendentals=transcendentals,
                           bytes_accessed=bytes_accessed)


@jax.jit
def transformer_forward(x, packed):
    """Whole DEPTH-layer transformer in a single pallas_call."""
    xf = x.reshape(BT, DIM)
    args = (xf, _make_attn_bias()) + tuple(packed)
    out = pl.pallas_call(
        transformer_kernel,
        out_shape=jax.ShapeDtypeStruct((BT, DIM), jnp.float32),
        grid_spec=pltpu.PrefetchScalarGridSpec(
            num_scalar_prefetch=0,
            grid=(1,),
            in_specs=[_full_spec(a.shape) for a in args],
            out_specs=_full_spec((BT, DIM)),
        ),
        compiler_params=pltpu.CompilerParams(
            dimension_semantics=("arbitrary",)),
        cost_estimate=_cost_estimate(args, BT * DIM * 4),
    )(*args)
    return out.reshape(B, N, DIM)


# ---------------------------- parameter init / packing -----------------------
def init_params(key):
    """PyTorch-style per-layer parameters (f32), used by the pure-JAX reference."""
    params = []
    for _ in range(DEPTH):
        keys = jax.random.split(key, 8)
        key = keys[0]
        g1 = jnp.ones((1, DIM), jnp.float32)
        b1 = jnp.zeros((1, DIM), jnp.float32)
        wqkv = 0.02 * jax.random.normal(keys[1], (DIM, 3 * INNER), jnp.float32)
        wout = 0.02 * jax.random.normal(keys[2], (INNER, DIM), jnp.float32)
        bout = 0.02 * jax.random.normal(keys[3], (1, DIM), jnp.float32)
        g2 = jnp.ones((1, DIM), jnp.float32)
        b2 = jnp.zeros((1, DIM), jnp.float32)
        w1 = 0.02 * jax.random.normal(keys[4], (DIM, MLP_DIM), jnp.float32)
        bf1 = 0.02 * jax.random.normal(keys[5], (1, MLP_DIM), jnp.float32)
        w2 = 0.02 * jax.random.normal(keys[6], (MLP_DIM, DIM), jnp.float32)
        bf2 = 0.02 * jax.random.normal(keys[7], (1, DIM), jnp.float32)
        params.append((g1, b1, wqkv, wout, bout, g2, b2, w1, bf1, w2, bf2))
    return params


def pack_params(params):
    """One-time repack:
       * per-head [Wq*scale | Wk | Wv] stacked to (DEPTH, HEADS, DIM, 3*DH) for one
         batched QKV dot per layer,
       * per-head Wo stacked to (DEPTH, HEADS, DH, DIM) for one batched fold,
       * matmul weights cast to bf16 (f32 accumulation in-kernel)."""
    g1s, b1s, wqkvs, wos, bos = [], [], [], [], []
    g2s, b2s, w1s, bf1s, w2s, bf2s = [], [], [], [], [], []
    for (g1, b1, wqkv, wout, bout, g2, b2, w1, bf1, w2, bf2) in params:
        g1s.append(g1); b1s.append(b1)
        wq_full = wqkv[:, :INNER]
        wk_full = wqkv[:, INNER:2 * INNER]
        wv_full = wqkv[:, 2 * INNER:]
        per_head_qkv, per_head_wo = [], []
        for h in range(HEADS):
            sl = slice(h * DH, (h + 1) * DH)
            per_head_qkv.append(jnp.concatenate(
                [wq_full[:, sl] * SCALE, wk_full[:, sl], wv_full[:, sl]], axis=1))
            per_head_wo.append(wout[sl, :])
        wqkvs.append(jnp.stack(per_head_qkv))   # (HEADS, DIM, 3*DH)
        wos.append(jnp.stack(per_head_wo))      # (HEADS, DH, DIM)
        bos.append(bout)
        g2s.append(g2); b2s.append(b2)
        w1s.append(w1); bf1s.append(bf1)
        w2s.append(w2); bf2s.append(bf2)
    f32, bf16 = jnp.float32, jnp.bfloat16
    return (
        jnp.stack(g1s).astype(f32),      # (DEPTH, 1, DIM)
        jnp.stack(b1s).astype(f32),
        jnp.stack(wqkvs).astype(bf16),   # (DEPTH, HEADS, DIM, 3*DH)
        jnp.stack(wos).astype(bf16),     # (DEPTH, HEADS, DH, DIM)
        jnp.stack(bos).astype(f32),      # (DEPTH, 1, DIM)
        jnp.stack(g2s).astype(f32),
        jnp.stack(b2s).astype(f32),
        jnp.stack(w1s).astype(bf16),     # (DEPTH, DIM, MLP_DIM)
        jnp.stack(bf1s).astype(f32),     # (DEPTH, 1, MLP_DIM)
        jnp.stack(w2s).astype(bf16),     # (DEPTH, MLP_DIM, DIM)
        jnp.stack(bf2s).astype(f32),     # (DEPTH, 1, DIM)
    )


# ---------------------------- pure-JAX reference -----------------------------
def reference_forward(x, params):
    for (g1, b1, wqkv, wout, bout, g2, b2, w1, bf1, w2, bf2) in params:
        xn = _layernorm(x, g1, b1)
        qkv = xn @ wqkv
        q, k, v = jnp.split(qkv, 3, axis=-1)
        split = lambda t: t.reshape(B, N, HEADS, DH).transpose(0, 2, 1, 3)
        q, k, v = split(q), split(k), split(v)
        dots = jnp.einsum('bhnd,bhmd->bhnm', q, k) * SCALE
        attn = jax.nn.softmax(dots, axis=-1)
        out = jnp.einsum('bhnm,bhmd->bhnd', attn, v)
        out = out.transpose(0, 2, 1, 3).reshape(B, N, INNER)
        x = x + out @ wout + bout
        xn2 = _layernorm(x, g2, b2)
        h = jax.nn.gelu(xn2 @ w1 + bf1, approximate=False)
        x = x + h @ w2 + bf2
    return x


# --------------------------------- main --------------------------------------
if __name__ == "__main__":
    key = jax.random.PRNGKey(0)
    kx, kp = jax.random.split(key)
    x = jax.random.normal(kx, (B, N, DIM), jnp.float32)
    params = init_params(kp)
    packed = pack_params(params)

    out = transformer_forward(x, packed)
    out = jax.block_until_ready(out)

    ref = jax.block_until_ready(reference_forward(x, params))
    assert out.shape == (B, N, DIM)
    np.testing.assert_allclose(np.asarray(out), np.asarray(ref),
                               atol=1e-2, rtol=1e-2)
    print("KERNEL_OK")
</pallas_src>

<mosaic_0001>
module attributes {stable_mosaic.version = 11 : i64} {
  func.func @transformer_kernel(%arg0: i32, %arg1: memref<16x32xf32, #tpu.memory_space<vmem>>, %arg2: memref<1x16x16xf32, #tpu.memory_space<vmem>>, %arg3: memref<2x1x32xf32, #tpu.memory_space<vmem>>, %arg4: memref<2x1x32xf32, #tpu.memory_space<vmem>>, %arg5: memref<2x4x32x192xbf16, #tpu.memory_space<vmem>>, %arg6: memref<2x4x64x32xbf16, #tpu.memory_space<vmem>>, %arg7: memref<2x1x32xf32, #tpu.memory_space<vmem>>, %arg8: memref<2x1x32xf32, #tpu.memory_space<vmem>>, %arg9: memref<2x1x32xf32, #tpu.memory_space<vmem>>, %arg10: memref<2x32x64xbf16, #tpu.memory_space<vmem>>, %arg11: memref<2x1x64xf32, #tpu.memory_space<vmem>>, %arg12: memref<2x64x32xbf16, #tpu.memory_space<vmem>>, %arg13: memref<2x1x32xf32, #tpu.memory_space<vmem>>, %arg14: memref<16x32xf32, #tpu.memory_space<vmem>>) attributes {dimension_semantics = [#tpu.dimension_semantics<arbitrary>], iteration_bounds = array<i64: 1>, scalar_prefetch = 0 : i64, scratch_operands = 0 : i64, tpu.core_type = #tpu.core_type<tc>, window_params = [{pipeline_mode = #tpu.pipeline_mode<synchronous>, transform_indices = @transform_0, window_bounds = array<i64: 16, 32>}, {pipeline_mode = #tpu.pipeline_mode<synchronous>, transform_indices = @transform_1, window_bounds = array<i64: 1, 16, 16>}, {pipeline_mode = #tpu.pipeline_mode<synchronous>, transform_indices = @transform_2, window_bounds = array<i64: 2, 1, 32>}, {pipeline_mode = #tpu.pipeline_mode<synchronous>, transform_indices = @transform_3, window_bounds = array<i64: 2, 1, 32>}, {pipeline_mode = #tpu.pipeline_mode<synchronous>, transform_indices = @transform_4, window_bounds = array<i64: 2, 4, 32, 192>}, {pipeline_mode = #tpu.pipeline_mode<synchronous>, transform_indices = @transform_5, window_bounds = array<i64: 2, 4, 64, 32>}, {pipeline_mode = #tpu.pipeline_mode<synchronous>, transform_indices = @transform_6, window_bounds = array<i64: 2, 1, 32>}, {pipeline_mode = #tpu.pipeline_mode<synchronous>, transform_indices = @transform_7, window_bounds = array<i64: 2, 1, 32>}, {pipeline_mode = #tpu.pipeline_mode<synchronous>, transform_indices = @transform_8, window_bounds = array<i64: 2, 1, 32>}, {pipeline_mode = #tpu.pipeline_mode<synchronous>, transform_indices = @transform_9, window_bounds = array<i64: 2, 32, 64>}, {pipeline_mode = #tpu.pipeline_mode<synchronous>, transform_indices = @transform_10, window_bounds = array<i64: 2, 1, 64>}, {pipeline_mode = #tpu.pipeline_mode<synchronous>, transform_indices = @transform_11, window_bounds = array<i64: 2, 64, 32>}, {pipeline_mode = #tpu.pipeline_mode<synchronous>, transform_indices = @transform_12, window_bounds = array<i64: 2, 1, 32>}, {pipeline_mode = #tpu.pipeline_mode<synchronous>, transform_indices = @transform_13, window_bounds = array<i64: 16, 32>}]} {
    %c0 = arith.constant 0 : index
    %c0_0 = arith.constant 0 : index
    %0 = vector.load %arg1[%c0, %c0_0] : memref<16x32xf32, #tpu.memory_space<vmem>>, vector<16x32xf32>
    %c0_1 = arith.constant 0 : index
    %c0_2 = arith.constant 0 : index
    %c0_3 = arith.constant 0 : index
    %1 = vector.load %arg2[%c0_1, %c0_2, %c0_3] : memref<1x16x16xf32, #tpu.memory_space<vmem>>, vector<1x16x16xf32>
    %c0_4 = arith.constant 0 : index
    %c0_5 = arith.constant 0 : index
    %c0_6 = arith.constant 0 : index
    %2 = vector.load %arg3[%c0_4, %c0_5, %c0_6] : memref<2x1x32xf32, #tpu.memory_space<vmem>>, vector<1x1x32xf32>
    %3 = vector.shape_cast %2 : vector<1x1x32xf32> to vector<1x32xf32>
    %c0_7 = arith.constant 0 : index
    %c0_8 = arith.constant 0 : index
    %c0_9 = arith.constant 0 : index
    %4 = vector.load %arg4[%c0_7, %c0_8, %c0_9] : memref<2x1x32xf32, #tpu.memory_space<vmem>>, vector<1x1x32xf32>
    %5 = vector.shape_cast %4 : vector<1x1x32xf32> to vector<1x32xf32>
    %cst = arith.constant dense<0.000000e+00> : vector<16xf32>
    %6 = vector.multi_reduction <add>, %0, %cst [1] : vector<16x32xf32> to vector<16xf32>
    %7 = vector.shape_cast %6 : vector<16xf32> to vector<16x1xf32>
    %cst_10 = arith.constant 3.200000e+01 : f32
    %8 = vector.broadcast %cst_10 : f32 to vector<16x1xf32>
    %9 = arith.divf %7, %8 : vector<16x1xf32>
    %10 = vector.broadcast %9 : vector<16x1xf32> to vector<16x32xf32>
    %11 = arith.subf %0, %10 : vector<16x32xf32>
    %12 = arith.mulf %11, %11 : vector<16x32xf32>
    %cst_11 = arith.constant dense<0.000000e+00> : vector<16xf32>
    %13 = vector.multi_reduction <add>, %12, %cst_11 [1] : vector<16x32xf32> to vector<16xf32>
    %14 = vector.shape_cast %13 : vector<16xf32> to vector<16x1xf32>
    %cst_12 = arith.constant 3.200000e+01 : f32
    %15 = vector.broadcast %cst_12 : f32 to vector<16x1xf32>
    %16 = arith.divf %14, %15 : vector<16x1xf32>
    %17 = vector.broadcast %9 : vector<16x1xf32> to vector<16x32xf32>
    %18 = arith.subf %0, %17 : vector<16x32xf32>
    %cst_13 = arith.constant 9.99999974E-6 : f32
    %19 = vector.broadcast %cst_13 : f32 to vector<16x1xf32>
    %20 = arith.addf %16, %19 : vector<16x1xf32>
    %21 = math.rsqrt %20 : vector<16x1xf32>
    %22 = vector.broadcast %21 : vector<16x1xf32> to vector<16x32xf32>
    %23 = arith.mulf %18, %22 : vector<16x32xf32>
    %24 = vector.broadcast %3 : vector<1x32xf32> to vector<16x32xf32>
    %25 = arith.mulf %23, %24 : vector<16x32xf32>
    %26 = vector.broadcast %5 : vector<1x32xf32> to vector<16x32xf32>
    %27 = arith.addf %25, %26 : vector<16x32xf32>
    %28 = arith.truncf %27 : vector<16x32xf32> to vector<16x32xbf16>
    %29 = vector.shape_cast %28 : vector<16x32xbf16> to vector<1x16x32xbf16>
    %30 = vector.shape_cast %29 : vector<1x16x32xbf16> to vector<1x16x32xbf16>
    %31 = vector.broadcast %30 : vector<1x16x32xbf16> to vector<4x16x32xbf16>
    %c0_14 = arith.constant 0 : index
    %c0_15 = arith.constant 0 : index
    %c0_16 = arith.constant 0 : index
    %c0_17 = arith.constant 0 : index
    %32 = vector.load %arg5[%c0_14, %c0_15, %c0_16, %c0_17] : memref<2x4x32x192xbf16, #tpu.memory_space<vmem>>, vector<1x4x32x192xbf16>
    %33 = vector.shape_cast %32 : vector<1x4x32x192xbf16> to vector<4x32x192xbf16>
    "tpu.trace_start"() <{level = 10 : i32, message = "hnc,hcd->hnd"}> : () -> ()
    %cst_18 = arith.constant dense<0.000000e+00> : vector<4x16x192xf32>
    %34 = tpu.matmul %31, %33, %cst_18 {dimension_numbers = #tpu.dot_dimension_numbers<[2], [1], [1], [2], [0, 0, 0, 1, 1, 2], [0], [0]>} : vector<4x16x32xbf16>, vector<4x32x192xbf16>, vector<4x16x192xf32> -> vector<4x16x192xf32>
    "tpu.trace_stop"() : () -> ()
    %35 = vector.extract_strided_slice %34 {offsets = [0, 0, 0], sizes = [4, 16, 64], strides = [1, 1, 1]} : vector<4x16x192xf32> to vector<4x16x64xf32>
    %36 = arith.truncf %35 : vector<4x16x64xf32> to vector<4x16x64xbf16>
    %37 = vector.extract_strided_slice %34 {offsets = [0, 0, 64], sizes = [4, 16, 64], strides = [1, 1, 1]} : vector<4x16x192xf32> to vector<4x16x64xf32>
    %38 = arith.truncf %37 : vector<4x16x64xf32> to vector<4x16x64xbf16>
    %39 = vector.extract_strided_slice %34 {offsets = [0, 0, 128], sizes = [4, 16, 64], strides = [1, 1, 1]} : vector<4x16x192xf32> to vector<4x16x64xf32>
    %40 = arith.truncf %39 : vector<4x16x64xf32> to vector<4x16x64xbf16>
    %c0_19 = arith.constant 0 : index
    %c0_20 = arith.constant 0 : index
    %c0_21 = arith.constant 0 : index
    %c0_22 = arith.constant 0 : index
    %41 = vector.load %arg6[%c0_19, %c0_20, %c0_21, %c0_22] : memref<2x4x64x32xbf16, #tpu.memory_space<vmem>>, vector<1x4x64x32xbf16>
    %42 = vector.shape_cast %41 : vector<1x4x64x32xbf16> to vector<4x64x32xbf16>
    "tpu.trace_start"() <{level = 10 : i32, message = "hnd,hdc->hnc"}> : () -> ()
    %cst_23 = arith.constant dense<0.000000e+00> : vector<4x16x32xf32>
    %43 = tpu.matmul %40, %42, %cst_23 {dimension_numbers = #tpu.dot_dimension_numbers<[2], [1], [1], [2], [0, 0, 0, 1, 1, 2], [0], [0]>} : vector<4x16x64xbf16>, vector<4x64x32xbf16>, vector<4x16x32xf32> -> vector<4x16x32xf32>
    "tpu.trace_stop"() : () -> ()
    "tpu.trace_start"() <{level = 10 : i32, message = "hnd,hmd->hnm"}> : () -> ()
    %cst_24 = arith.constant dense<0.000000e+00> : vector<4x16x16xf32>
    %44 = tpu.matmul %36, %38, %cst_24 {dimension_numbers = #tpu.dot_dimension_numbers<[2], [2], [1], [1], [0, 0, 0, 1, 1, 1], [0], [0]>} : vector<4x16x64xbf16>, vector<4x16x64xbf16>, vector<4x16x16xf32> -> vector<4x16x16xf32>
    "tpu.trace_stop"() : () -> ()
    %45 = vector.broadcast %1 : vector<1x16x16xf32> to vector<4x16x16xf32>
    %46 = arith.addf %44, %45 : vector<4x16x16xf32>
    %cst_25 = arith.constant dense<0xFF800000> : vector<4x16xf32>
    %47 = vector.multi_reduction <maximumf>, %46, %cst_25 [2] : vector<4x16x16xf32> to vector<4x16xf32>
    %48 = vector.shape_cast %47 : vector<4x16xf32> to vector<4x16x1xf32>
    %49 = vector.broadcast %48 : vector<4x16x1xf32> to vector<4x16x16xf32>
    %50 = arith.subf %46, %49 : vector<4x16x16xf32>
    %51 = math.exp %50 : vector<4x16x16xf32>
    %cst_26 = arith.constant dense<0.000000e+00> : vector<4x16xf32>
    %52 = vector.multi_reduction <add>, %51, %cst_26 [2] : vector<4x16x16xf32> to vector<4x16xf32>
    %53 = vector.shape_cast %52 : vector<4x16xf32> to vector<4x16x1xf32>
    %54 = tpu.reciprocal %53 {approx = true} : vector<4x16x1xf32> -> vector<4x16x1xf32>
    %55 = vector.broadcast %54 : vector<4x16x1xf32> to vector<4x16x16xf32>
    %56 = arith.mulf %51, %55 : vector<4x16x16xf32>
    %57 = arith.truncf %56 : vector<4x16x16xf32> to vector<4x16x16xbf16>
    %58 = arith.truncf %43 : vector<4x16x32xf32> to vector<4x16x32xbf16>
    "tpu.trace_start"() <{level = 10 : i32, message = "hnm,hmd->hnd"}> : () -> ()
    %cst_27 = arith.constant dense<0.000000e+00> : vector<4x16x32xf32>
    %59 = tpu.matmul %57, %58, %cst_27 {dimension_numbers = #tpu.dot_dimension_numbers<[2], [1], [1], [2], [0, 0, 0, 1, 1, 2], [0], [0]>} : vector<4x16x16xbf16>, vector<4x16x32xbf16>, vector<4x16x32xf32> -> vector<4x16x32xf32>
    "tpu.trace_stop"() : () -> ()
    %cst_28 = arith.constant dense<0.000000e+00> : vector<16x32xf32>
    %60 = vector.multi_reduction <add>, %59, %cst_28 [0] : vector<4x16x32xf32> to vector<16x32xf32>
    %61 = arith.addf %0, %60 : vector<16x32xf32>
    %c0_29 = arith.constant 0 : index
    %c0_30 = arith.constant 0 : index
    %c0_31 = arith.constant 0 : index
    %62 = vector.load %arg7[%c0_29, %c0_30, %c0_31] : memref<2x1x32xf32, #tpu.memory_space<vmem>>, vector<1x1x32xf32>
    %63 = vector.shape_cast %62 : vector<1x1x32xf32> to vector<1x32xf32>
    %64 = vector.broadcast %63 : vector<1x32xf32> to vector<16x32xf32>
    %65 = arith.addf %61, %64 : vector<16x32xf32>
    %c0_32 = arith.constant 0 : index
    %c0_33 = arith.constant 0 : index
    %c0_34 = arith.constant 0 : index
    %66 = vector.load %arg8[%c0_32, %c0_33, %c0_34] : memref<2x1x32xf32, #tpu.memory_space<vmem>>, vector<1x1x32xf32>
    %67 = vector.shape_cast %66 : vector<1x1x32xf32> to vector<1x32xf32>
    %c0_35 = arith.constant 0 : index
    %c0_36 = arith.constant 0 : index
    %c0_37 = arith.constant 0 : index
    %68 = vector.load %arg9[%c0_35, %c0_36, %c0_37] : memref<2x1x32xf32, #tpu.memory_space<vmem>>, vector<1x1x32xf32>
    %69 = vector.shape_cast %68 : vector<1x1x32xf32> to vector<1x32xf32>
    %cst_38 = arith.constant dense<0.000000e+00> : vector<16xf32>
    %70 = vector.multi_reduction <add>, %65, %cst_38 [1] : vector<16x32xf32> to vector<16xf32>
    %71 = vector.shape_cast %70 : vector<16xf32> to vector<16x1xf32>
    %cst_39 = arith.constant 3.200000e+01 : f32
    %72 = vector.broadcast %cst_39 : f32 to vector<16x1xf32>
    %73 = arith.divf %71, %72 : vector<16x1xf32>
    %74 = vector.broadcast %73 : vector<16x1xf32> to vector<16x32xf32>
    %75 = arith.subf %65, %74 : vector<16x32xf32>
    %76 = arith.mulf %75, %75 : vector<16x32xf32>
    %cst_40 = arith.constant dense<0.000000e+00> : vector<16xf32>
    %77 = vector.multi_reduction <add>, %76, %cst_40 [1] : vector<16x32xf32> to vector<16xf32>
    %78 = vector.shape_cast %77 : vector<16xf32> to vector<16x1xf32>
    %cst_41 = arith.constant 3.200000e+01 : f32
    %79 = vector.broadcast %cst_41 : f32 to vector<16x1xf32>
    %80 = arith.divf %78, %79 : vector<16x1xf32>
    %81 = vector.broadcast %73 : vector<16x1xf32> to vector<16x32xf32>
    %82 = arith.subf %65, %81 : vector<16x32xf32>
    %cst_42 = arith.constant 9.99999974E-6 : f32
    %83 = vector.broadcast %cst_42 : f32 to vector<16x1xf32>
    %84 = arith.addf %80, %83 : vector<16x1xf32>
    %85 = math.rsqrt %84 : vector<16x1xf32>
    %86 = vector.broadcast %85 : vector<16x1xf32> to vector<16x32xf32>
    %87 = arith.mulf %82, %86 : vector<16x32xf32>
    %88 = vector.broadcast %67 : vector<1x32xf32> to vector<16x32xf32>
    %89 = arith.mulf %87, %88 : vector<16x32xf32>
    %90 = vector.broadcast %69 : vector<1x32xf32> to vector<16x32xf32>
    %91 = arith.addf %89, %90 : vector<16x32xf32>
    %92 = arith.truncf %91 : vector<16x32xf32> to vector<16x32xbf16>
    %c0_43 = arith.constant 0 : index
    %c0_44 = arith.constant 0 : index
    %c0_45 = arith.constant 0 : index
    %93 = vector.load %arg10[%c0_43, %c0_44, %c0_45] : memref<2x32x64xbf16, #tpu.memory_space<vmem>>, vector<1x32x64xbf16>
    %94 = vector.shape_cast %93 : vector<1x32x64xbf16> to vector<32x64xbf16>
    %cst_46 = arith.constant dense<0.000000e+00> : vector<16x64xf32>
    %95 = tpu.matmul %92, %94, %cst_46 {dimension_numbers = #tpu.dot_dimension_numbers<[1], [0], [0], [1], [0, 0, 1, 1], [], []>} : vector<16x32xbf16>, vector<32x64xbf16>, vector<16x64xf32> -> vector<16x64xf32>
    %c0_47 = arith.constant 0 : index
    %c0_48 = arith.constant 0 : index
    %c0_49 = arith.constant 0 : index
    %96 = vector.load %arg11[%c0_47, %c0_48, %c0_49] : memref<2x1x64xf32, #tpu.memory_space<vmem>>, vector<1x1x64xf32>
    %97 = vector.shape_cast %96 : vector<1x1x64xf32> to vector<1x64xf32>
    %98 = vector.broadcast %97 : vector<1x64xf32> to vector<16x64xf32>
    %99 = arith.addf %95, %98 : vector<16x64xf32>
    %cst_50 = arith.constant 5.000000e-01 : f32
    %100 = vector.broadcast %cst_50 : f32 to vector<16x64xf32>
    %101 = arith.mulf %100, %99 : vector<16x64xf32>
    %cst_51 = arith.constant 4.471500e-02 : f32
    %102 = vector.broadcast %cst_51 : f32 to vector<16x64xf32>
    %103 = arith.mulf %102, %99 : vector<16x64xf32>
    %104 = arith.mulf %103, %99 : vector<16x64xf32>
    %105 = arith.mulf %104, %99 : vector<16x64xf32>
    %106 = arith.addf %99, %105 : vector<16x64xf32>
    %cst_52 = arith.constant 0.797884583 : f32
    %107 = vector.broadcast %cst_52 : f32 to vector<16x64xf32>
    %108 = arith.mulf %107, %106 : vector<16x64xf32>
    %109 = math.tanh %108 : vector<16x64xf32>
    %cst_53 = arith.constant 1.000000e+00 : f32
    %110 = vector.broadcast %cst_53 : f32 to vector<16x64xf32>
    %111 = arith.addf %110, %109 : vector<16x64xf32>
    %112 = arith.mulf %101, %111 : vector<16x64xf32>
    %113 = arith.truncf %112 : vector<16x64xf32> to vector<16x64xbf16>
    %c0_54 = arith.constant 0 : index
    %c0_55 = arith.constant 0 : index
    %c0_56 = arith.constant 0 : index
    %114 = vector.load %arg12[%c0_54, %c0_55, %c0_56] : memref<2x64x32xbf16, #tpu.memory_space<vmem>>, vector<1x64x32xbf16>
    %115 = vector.shape_cast %114 : vector<1x64x32xbf16> to vector<64x32xbf16>
    %cst_57 = arith.constant dense<0.000000e+00> : vector<16x32xf32>
    %116 = tpu.matmul %113, %115, %cst_57 {dimension_numbers = #tpu.dot_dimension_numbers<[1], [0], [0], [1], [0, 0, 1, 1], [], []>} : vector<16x64xbf16>, vector<64x32xbf16>, vector<16x32xf32> -> vector<16x32xf32>
    %c0_58 = arith.constant 0 : index
    %c0_59 = arith.constant 0 : index
    %c0_60 = arith.constant 0 : index
    %117 = vector.load %arg13[%c0_58, %c0_59, %c0_60] : memref<2x1x32xf32, #tpu.memory_space<vmem>>, vector<1x1x32xf32>
    %118 = vector.shape_cast %117 : vector<1x1x32xf32> to vector<1x32xf32>
    %119 = vector.broadcast %118 : vector<1x32xf32> to vector<16x32xf32>
    %120 = arith.addf %116, %119 : vector<16x32xf32>
    %121 = arith.addf %65, %120 : vector<16x32xf32>
    %c1 = arith.constant 1 : index
    %c0_61 = arith.constant 0 : index
    %c0_62 = arith.constant 0 : index
    %122 = vector.load %arg3[%c1, %c0_61, %c0_62] : memref<2x1x32xf32, #tpu.memory_space<vmem>>, vector<1x1x32xf32>
    %123 = vector.shape_cast %122 : vector<1x1x32xf32> to vector<1x32xf32>
    %c1_63 = arith.constant 1 : index
    %c0_64 = arith.constant 0 : index
    %c0_65 = arith.constant 0 : index
    %124 = vector.load %arg4[%c1_63, %c0_64, %c0_65] : memref<2x1x32xf32, #tpu.memory_space<vmem>>, vector<1x1x32xf32>
    %125 = vector.shape_cast %124 : vector<1x1x32xf32> to vector<1x32xf32>
    %cst_66 = arith.constant dense<0.000000e+00> : vector<16xf32>
    %126 = vector.multi_reduction <add>, %121, %cst_66 [1] : vector<16x32xf32> to vector<16xf32>
    %127 = vector.shape_cast %126 : vector<16xf32> to vector<16x1xf32>
    %cst_67 = arith.constant 3.200000e+01 : f32
    %128 = vector.broadcast %cst_67 : f32 to vector<16x1xf32>
    %129 = arith.divf %127, %128 : vector<16x1xf32>
    %130 = vector.broadcast %129 : vector<16x1xf32> to vector<16x32xf32>
    %131 = arith.subf %121, %130 : vector<16x32xf32>
    %132 = arith.mulf %131, %131 : vector<16x32xf32>
    %cst_68 = arith.constant dense<0.000000e+00> : vector<16xf32>
    %133 = vector.multi_reduction <add>, %132, %cst_68 [1] : vector<16x32xf32> to vector<16xf32>
    %134 = vector.shape_cast %133 : vector<16xf32> to vector<16x1xf32>
    %cst_69 = arith.constant 3.200000e+01 : f32
    %135 = vector.broadcast %cst_69 : f32 to vector<16x1xf32>
    %136 = arith.divf %134, %135 : vector<16x1xf32>
    %137 = vector.broadcast %129 : vector<16x1xf32> to vector<16x32xf32>
    %138 = arith.subf %121, %137 : vector<16x32xf32>
    %cst_70 = arith.constant 9.99999974E-6 : f32
    %139 = vector.broadcast %cst_70 : f32 to vector<16x1xf32>
    %140 = arith.addf %136, %139 : vector<16x1xf32>
    %141 = math.rsqrt %140 : vector<16x1xf32>
    %142 = vector.broadcast %141 : vector<16x1xf32> to vector<16x32xf32>
    %143 = arith.mulf %138, %142 : vector<16x32xf32>
    %144 = vector.broadcast %123 : vector<1x32xf32> to vector<16x32xf32>
    %145 = arith.mulf %143, %144 : vector<16x32xf32>
    %146 = vector.broadcast %125 : vector<1x32xf32> to vector<16x32xf32>
    %147 = arith.addf %145, %146 : vector<16x32xf32>
    %148 = arith.truncf %147 : vector<16x32xf32> to vector<16x32xbf16>
    %149 = vector.shape_cast %148 : vector<16x32xbf16> to vector<1x16x32xbf16>
    %150 = vector.shape_cast %149 : vector<1x16x32xbf16> to vector<1x16x32xbf16>
    %151 = vector.broadcast %150 : vector<1x16x32xbf16> to vector<4x16x32xbf16>
    %c1_71 = arith.constant 1 : index
    %c0_72 = arith.constant 0 : index
    %c0_73 = arith.constant 0 : index
    %c0_74 = arith.constant 0 : index
    %152 = vector.load %arg5[%c1_71, %c0_72, %c0_73, %c0_74] : memref<2x4x32x192xbf16, #tpu.memory_space<vmem>>, vector<1x4x32x192xbf16>
    %153 = vector.shape_cast %152 : vector<1x4x32x192xbf16> to vector<4x32x192xbf16>
    "tpu.trace_start"() <{level = 10 : i32, message = "hnc,hcd->hnd"}> : () -> ()
    %cst_75 = arith.constant dense<0.000000e+00> : vector<4x16x192xf32>
    %154 = tpu.matmul %151, %153, %cst_75 {dimension_numbers = #tpu.dot_dimension_numbers<[2], [1], [1], [2], [0, 0, 0, 1, 1, 2], [0], [0]>} : vector<4x16x32xbf16>, vector<4x32x192xbf16>, vector<4x16x192xf32> -> vector<4x16x192xf32>
    "tpu.trace_stop"() : () -> ()
    %155 = vector.extract_strided_slice %154 {offsets = [0, 0, 0], sizes = [4, 16, 64], strides = [1, 1, 1]} : vector<4x16x192xf32> to vector<4x16x64xf32>
    %156 = arith.truncf %155 : vector<4x16x64xf32> to vector<4x16x64xbf16>
    %157 = vector.extract_strided_slice %154 {offsets = [0, 0, 64], sizes = [4, 16, 64], strides = [1, 1, 1]} : vector<4x16x192xf32> to vector<4x16x64xf32>
    %158 = arith.truncf %157 : vector<4x16x64xf32> to vector<4x16x64xbf16>
    %159 = vector.extract_strided_slice %154 {offsets = [0, 0, 128], sizes = [4, 16, 64], strides = [1, 1, 1]} : vector<4x16x192xf32> to vector<4x16x64xf32>
    %160 = arith.truncf %159 : vector<4x16x64xf32> to vector<4x16x64xbf16>
    %c1_76 = arith.constant 1 : index
    %c0_77 = arith.constant 0 : index
    %c0_78 = arith.constant 0 : index
    %c0_79 = arith.constant 0 : index
    %161 = vector.load %arg6[%c1_76, %c0_77, %c0_78, %c0_79] : memref<2x4x64x32xbf16, #tpu.memory_space<vmem>>, vector<1x4x64x32xbf16>
    %162 = vector.shape_cast %161 : vector<1x4x64x32xbf16> to vector<4x64x32xbf16>
    "tpu.trace_start"() <{level = 10 : i32, message = "hnd,hdc->hnc"}> : () -> ()
    %cst_80 = arith.constant dense<0.000000e+00> : vector<4x16x32xf32>
    %163 = tpu.matmul %160, %162, %cst_80 {dimension_numbers = #tpu.dot_dimension_numbers<[2], [1], [1], [2], [0, 0, 0, 1, 1, 2], [0], [0]>} : vector<4x16x64xbf16>, vector<4x64x32xbf16>, vector<4x16x32xf32> -> vector<4x16x32xf32>
    "tpu.trace_stop"() : () -> ()
    "tpu.trace_start"() <{level = 10 : i32, message = "hnd,hmd->hnm"}> : () -> ()
    %cst_81 = arith.constant dense<0.000000e+00> : vector<4x16x16xf32>
    %164 = tpu.matmul %156, %158, %cst_81 {dimension_numbers = #tpu.dot_dimension_numbers<[2], [2], [1], [1], [0, 0, 0, 1, 1, 1], [0], [0]>} : vector<4x16x64xbf16>, vector<4x16x64xbf16>, vector<4x16x16xf32> -> vector<4x16x16xf32>
    "tpu.trace_stop"() : () -> ()
    %165 = vector.broadcast %1 : vector<1x16x16xf32> to vector<4x16x16xf32>
    %166 = arith.addf %164, %165 : vector<4x16x16xf32>
    %cst_82 = arith.constant dense<0xFF800000> : vector<4x16xf32>
    %167 = vector.multi_reduction <maximumf>, %166, %cst_82 [2] : vector<4x16x16xf32> to vector<4x16xf32>
    %168 = vector.shape_cast %167 : vector<4x16xf32> to vector<4x16x1xf32>
    %169 = vector.broadcast %168 : vector<4x16x1xf32> to vector<4x16x16xf32>
    %170 = arith.subf %166, %169 : vector<4x16x16xf32>
    %171 = math.exp %170 : vector<4x16x16xf32>
    %cst_83 = arith.constant dense<0.000000e+00> : vector<4x16xf32>
    %172 = vector.multi_reduction <add>, %171, %cst_83 [2] : vector<4x16x16xf32> to vector<4x16xf32>
    %173 = vector.shape_cast %172 : vector<4x16xf32> to vector<4x16x1xf32>
    %174 = tpu.reciprocal %173 {approx = true} : vector<4x16x1xf32> -> vector<4x16x1xf32>
    %175 = vector.broadcast %174 : vector<4x16x1xf32> to vector<4x16x16xf32>
    %176 = arith.mulf %171, %175 : vector<4x16x16xf32>
    %177 = arith.truncf %176 : vector<4x16x16xf32> to vector<4x16x16xbf16>
    %178 = arith.truncf %163 : vector<4x16x32xf32> to vector<4x16x32xbf16>
    "tpu.trace_start"() <{level = 10 : i32, message = "hnm,hmd->hnd"}> : () -> ()
    %cst_84 = arith.constant dense<0.000000e+00> : vector<4x16x32xf32>
    %179 = tpu.matmul %177, %178, %cst_84 {dimension_numbers = #tpu.dot_dimension_numbers<[2], [1], [1], [2], [0, 0, 0, 1, 1, 2], [0], [0]>} : vector<4x16x16xbf16>, vector<4x16x32xbf16>, vector<4x16x32xf32> -> vector<4x16x32xf32>
    "tpu.trace_stop"() : () -> ()
    %cst_85 = arith.constant dense<0.000000e+00> : vector<16x32xf32>
    %180 = vector.multi_reduction <add>, %179, %cst_85 [0] : vector<4x16x32xf32> to vector<16x32xf32>
    %181 = arith.addf %121, %180 : vector<16x32xf32>
    %c1_86 = arith.constant 1 : index
    %c0_87 = arith.constant 0 : index
    %c0_88 = arith.constant 0 : index
    %182 = vector.load %arg7[%c1_86, %c0_87, %c0_88] : memref<2x1x32xf32, #tpu.memory_space<vmem>>, vector<1x1x32xf32>
    %183 = vector.shape_cast %182 : vector<1x1x32xf32> to vector<1x32xf32>
    %184 = vector.broadcast %183 : vector<1x32xf32> to vector<16x32xf32>
    %185 = arith.addf %181, %184 : vector<16x32xf32>
    %c1_89 = arith.constant 1 : index
    %c0_90 = arith.constant 0 : index
    %c0_91 = arith.constant 0 : index
    %186 = vector.load %arg8[%c1_89, %c0_90, %c0_91] : memref<2x1x32xf32, #tpu.memory_space<vmem>>, vector<1x1x32xf32>
    %187 = vector.shape_cast %186 : vector<1x1x32xf32> to vector<1x32xf32>
    %c1_92 = arith.constant 1 : index
    %c0_93 = arith.constant 0 : index
    %c0_94 = arith.constant 0 : index
    %188 = vector.load %arg9[%c1_92, %c0_93, %c0_94] : memref<2x1x32xf32, #tpu.memory_space<vmem>>, vector<1x1x32xf32>
    %189 = vector.shape_cast %188 : vector<1x1x32xf32> to vector<1x32xf32>
    %cst_95 = arith.constant dense<0.000000e+00> : vector<16xf32>
    %190 = vector.multi_reduction <add>, %185, %cst_95 [1] : vector<16x32xf32> to vector<16xf32>
    %191 = vector.shape_cast %190 : vector<16xf32> to vector<16x1xf32>
    %cst_96 = arith.constant 3.200000e+01 : f32
    %192 = vector.broadcast %cst_96 : f32 to vector<16x1xf32>
    %193 = arith.divf %191, %192 : vector<16x1xf32>
    %194 = vector.broadcast %193 : vector<16x1xf32> to vector<16x32xf32>
    %195 = arith.subf %185, %194 : vector<16x32xf32>
    %196 = arith.mulf %195, %195 : vector<16x32xf32>
    %cst_97 = arith.constant dense<0.000000e+00> : vector<16xf32>
    %197 = vector.multi_reduction <add>, %196, %cst_97 [1] : vector<16x32xf32> to vector<16xf32>
    %198 = vector.shape_cast %197 : vector<16xf32> to vector<16x1xf32>
    %cst_98 = arith.constant 3.200000e+01 : f32
    %199 = vector.broadcast %cst_98 : f32 to vector<16x1xf32>
    %200 = arith.divf %198, %199 : vector<16x1xf32>
    %201 = vector.broadcast %193 : vector<16x1xf32> to vector<16x32xf32>
    %202 = arith.subf %185, %201 : vector<16x32xf32>
    %cst_99 = arith.constant 9.99999974E-6 : f32
    %203 = vector.broadcast %cst_99 : f32 to vector<16x1xf32>
    %204 = arith.addf %200, %203 : vector<16x1xf32>
    %205 = math.rsqrt %204 : vector<16x1xf32>
    %206 = vector.broadcast %205 : vector<16x1xf32> to vector<16x32xf32>
    %207 = arith.mulf %202, %206 : vector<16x32xf32>
    %208 = vector.broadcast %187 : vector<1x32xf32> to vector<16x32xf32>
    %209 = arith.mulf %207, %208 : vector<16x32xf32>
    %210 = vector.broadcast %189 : vector<1x32xf32> to vector<16x32xf32>
    %211 = arith.addf %209, %210 : vector<16x32xf32>
    %212 = arith.truncf %211 : vector<16x32xf32> to vector<16x32xbf16>
    %c1_100 = arith.constant 1 : index
    %c0_101 = arith.constant 0 : index
    %c0_102 = arith.constant 0 : index
    %213 = vector.load %arg10[%c1_100, %c0_101, %c0_102] : memref<2x32x64xbf16, #tpu.memory_space<vmem>>, vector<1x32x64xbf16>
    %214 = vector.shape_cast %213 : vector<1x32x64xbf16> to vector<32x64xbf16>
    %cst_103 = arith.constant dense<0.000000e+00> : vector<16x64xf32>
    %215 = tpu.matmul %212, %214, %cst_103 {dimension_numbers = #tpu.dot_dimension_numbers<[1], [0], [0], [1], [0, 0, 1, 1], [], []>} : vector<16x32xbf16>, vector<32x64xbf16>, vector<16x64xf32> -> vector<16x64xf32>
    %c1_104 = arith.constant 1 : index
    %c0_105 = arith.constant 0 : index
    %c0_106 = arith.constant 0 : index
    %216 = vector.load %arg11[%c1_104, %c0_105, %c0_106] : memref<2x1x64xf32, #tpu.memory_space<vmem>>, vector<1x1x64xf32>
    %217 = vector.shape_cast %216 : vector<1x1x64xf32> to vector<1x64xf32>
    %218 = vector.broadcast %217 : vector<1x64xf32> to vector<16x64xf32>
    %219 = arith.addf %215, %218 : vector<16x64xf32>
    %cst_107 = arith.constant 5.000000e-01 : f32
    %220 = vector.broadcast %cst_107 : f32 to vector<16x64xf32>
    %221 = arith.mulf %220, %219 : vector<16x64xf32>
    %cst_108 = arith.constant 4.471500e-02 : f32
    %222 = vector.broadcast %cst_108 : f32 to vector<16x64xf32>
    %223 = arith.mulf %222, %219 : vector<16x64xf32>
    %224 = arith.mulf %223, %219 : vector<16x64xf32>
    %225 = arith.mulf %224, %219 : vector<16x64xf32>
    %226 = arith.addf %219, %225 : vector<16x64xf32>
    %cst_109 = arith.constant 0.797884583 : f32
    %227 = vector.broadcast %cst_109 : f32 to vector<16x64xf32>
    %228 = arith.mulf %227, %226 : vector<16x64xf32>
    %229 = math.tanh %228 : vector<16x64xf32>
    %cst_110 = arith.constant 1.000000e+00 : f32
    %230 = vector.broadcast %cst_110 : f32 to vector<16x64xf32>
    %231 = arith.addf %230, %229 : vector<16x64xf32>
    %232 = arith.mulf %221, %231 : vector<16x64xf32>
    %233 = arith.truncf %232 : vector<16x64xf32> to vector<16x64xbf16>
    %c1_111 = arith.constant 1 : index
    %c0_112 = arith.constant 0 : index
    %c0_113 = arith.constant 0 : index
    %234 = vector.load %arg12[%c1_111, %c0_112, %c0_113] : memref<2x64x32xbf16, #tpu.memory_space<vmem>>, vector<1x64x32xbf16>
    %235 = vector.shape_cast %234 : vector<1x64x32xbf16> to vector<64x32xbf16>
    %cst_114 = arith.constant dense<0.000000e+00> : vector<16x32xf32>
    %236 = tpu.matmul %233, %235, %cst_114 {dimension_numbers = #tpu.dot_dimension_numbers<[1], [0], [0], [1], [0, 0, 1, 1], [], []>} : vector<16x64xbf16>, vector<64x32xbf16>, vector<16x32xf32> -> vector<16x32xf32>
    %c1_115 = arith.constant 1 : index
    %c0_116 = arith.constant 0 : index
    %c0_117 = arith.constant 0 : index
    %237 = vector.load %arg13[%c1_115, %c0_116, %c0_117] : memref<2x1x32xf32, #tpu.memory_space<vmem>>, vector<1x1x32xf32>
    %238 = vector.shape_cast %237 : vector<1x1x32xf32> to vector<1x32xf32>
    %239 = vector.broadcast %238 : vector<1x32xf32> to vector<16x32xf32>
    %240 = arith.addf %236, %239 : vector<16x32xf32>
    %241 = arith.addf %185, %240 : vector<16x32xf32>
    %c0_118 = arith.constant 0 : index
    %c0_119 = arith.constant 0 : index
    %242 = vector.load %arg14[%c0_118, %c0_119] : memref<16x32xf32, #tpu.memory_space<vmem>>, vector<16x32xf32>
    tpu.vector_store %arg14[%c0_118, %c0_119], %241 {strides = array<i32>} : memref<16x32xf32, #tpu.memory_space<vmem>>, vector<16x32xf32>,
    return
  }
  func.func @transform_0(%arg0: i32) -> (i32, i32) {
    %c0_i32 = arith.constant 0 : i32
    %c0_i32_0 = arith.constant 0 : i32
    %c0_i32_1 = arith.constant 0 : i32
    return %c0_i32, %c0_i32_0 : i32, i32
  }
  func.func @transform_1(%arg0: i32) -> (i32, i32, i32) {
    %c0_i32 = arith.constant 0 : i32
    %c0_i32_0 = arith.constant 0 : i32
    %c0_i32_1 = arith.constant 0 : i32
    %c0_i32_2 = arith.constant 0 : i32
    return %c0_i32, %c0_i32_0, %c0_i32_1 : i32, i32, i32
  }
  func.func @transform_2(%arg0: i32) -> (i32, i32, i32) {
    %c0_i32 = arith.constant 0 : i32
    %c0_i32_0 = arith.constant 0 : i32
    %c0_i32_1 = arith.constant 0 : i32
    %c0_i32_2 = arith.constant 0 : i32
    return %c0_i32, %c0_i32_0, %c0_i32_1 : i32, i32, i32
  }
  func.func @transform_3(%arg0: i32) -> (i32, i32, i32) {
    %c0_i32 = arith.constant 0 : i32
    %c0_i32_0 = arith.constant 0 : i32
    %c0_i32_1 = arith.constant 0 : i32
    %c0_i32_2 = arith.constant 0 : i32
    return %c0_i32, %c0_i32_0, %c0_i32_1 : i32, i32, i32
  }
  func.func @transform_4(%arg0: i32) -> (i32, i32, i32, i32) {
    %c0_i32 = arith.constant 0 : i32
    %c0_i32_0 = arith.constant 0 : i32
    %c0_i32_1 = arith.constant 0 : i32
    %c0_i32_2 = arith.constant 0 : i32
    %c0_i32_3 = arith.constant 0 : i32
    return %c0_i32, %c0_i32_0, %c0_i32_1, %c0_i32_2 : i32, i32, i32, i32
  }
  func.func @transform_5(%arg0: i32) -> (i32, i32, i32, i32) {
    %c0_i32 = arith.constant 0 : i32
    %c0_i32_0 = arith.constant 0 : i32
    %c0_i32_1 = arith.constant 0 : i32
    %c0_i32_2 = arith.constant 0 : i32
    %c0_i32_3 = arith.constant 0 : i32
    return %c0_i32, %c0_i32_0, %c0_i32_1, %c0_i32_2 : i32, i32, i32, i32
  }
  func.func @transform_6(%arg0: i32) -> (i32, i32, i32) {
    %c0_i32 = arith.constant 0 : i32
    %c0_i32_0 = arith.constant 0 : i32
    %c0_i32_1 = arith.constant 0 : i32
    %c0_i32_2 = arith.constant 0 : i32
    return %c0_i32, %c0_i32_0, %c0_i32_1 : i32, i32, i32
  }
  func.func @transform_7(%arg0: i32) -> (i32, i32, i32) {
    %c0_i32 = arith.constant 0 : i32
    %c0_i32_0 = arith.constant 0 : i32
    %c0_i32_1 = arith.constant 0 : i32
    %c0_i32_2 = arith.constant 0 : i32
    return %c0_i32, %c0_i32_0, %c0_i32_1 : i32, i32, i32
  }
  func.func @transform_8(%arg0: i32) -> (i32, i32, i32) {
    %c0_i32 = arith.constant 0 : i32
    %c0_i32_0 = arith.constant 0 : i32
    %c0_i32_1 = arith.constant 0 : i32
    %c0_i32_2 = arith.constant 0 : i32
    return %c0_i32, %c0_i32_0, %c0_i32_1 : i32, i32, i32
  }
  func.func @transform_9(%arg0: i32) -> (i32, i32, i32) {
    %c0_i32 = arith.constant 0 : i32
    %c0_i32_0 = arith.constant 0 : i32
    %c0_i32_1 = arith.constant 0 : i32
    %c0_i32_2 = arith.constant 0 : i32
    return %c0_i32, %c0_i32_0, %c0_i32_1 : i32, i32, i32
  }
  func.func @transform_10(%arg0: i32) -> (i32, i32, i32) {
    %c0_i32 = arith.constant 0 : i32
    %c0_i32_0 = arith.constant 0 : i32
    %c0_i32_1 = arith.constant 0 : i32
    %c0_i32_2 = arith.constant 0 : i32
    return %c0_i32, %c0_i32_0, %c0_i32_1 : i32, i32, i32
  }
  func.func @transform_11(%arg0: i32) -> (i32, i32, i32) {
    %c0_i32 = arith.constant 0 : i32
    %c0_i32_0 = arith.constant 0 : i32
    %c0_i32_1 = arith.constant 0 : i32
    %c0_i32_2 = arith.constant 0 : i32
    return %c0_i32, %c0_i32_0, %c0_i32_1 : i32, i32, i32
  }
  func.func @transform_12(%arg0: i32) -> (i32, i32, i32) {
    %c0_i32 = arith.constant 0 : i32
    %c0_i32_0 = arith.constant 0 : i32
    %c0_i32_1 = arith.constant 0 : i32
    %c0_i32_2 = arith.constant 0 : i32
    return %c0_i32, %c0_i32_0, %c0_i32_1 : i32, i32, i32
  }
  func.func @transform_13(%arg0: i32) -> (i32, i32) {
    %c0_i32 = arith.constant 0 : i32
    %c0_i32_0 = arith.constant 0 : i32
    %c0_i32_1 = arith.constant 0 : i32
    return %c0_i32, %c0_i32_0 : i32, i32
  }
}

</mosaic_0001>

<bundles_post_ra>
// kernel: transformer_forward.1
= control target key start
LH: loop header
LB: loop body
LE: loop exit
PB: predicated region body
PF: predicated region fallthrough
CT: control target
= control target key end

     0   :  { %vm52_vm0 = vcmask 261120   ;;  %s3443_s0 = inlined_call_operand.vmem [shape: f32[16,32], index: 0, kind: input, shape index: {}]   ;;  %s3444_s1 = inlined_call_operand.vmem [shape: f32[1,16,16], index: 1, kind: input, shape index: {}]   ;;  %s3445_s2 = inlined_call_operand.vmem [shape: f32[2,1,32], index: 2, kind: input, shape index: {}]   ;;  %s3446_s3 = inlined_call_operand.vmem [shape: f32[2,1,32], index: 3, kind: input, shape index: {}]   ;;  %s3447_s4 = inlined_call_operand.vmem [shape: bf16[2,4,32,192], index: 4, kind: input, shape index: {}]   ;;  %s3448_s5 = inlined_call_operand.vmem [shape: bf16[2,4,64,32], index: 5, kind: input, shape index: {}]   ;;  %s3449_s6 = inlined_call_operand.vmem [shape: f32[2,1,32], index: 6, kind: input, shape index: {}]   ;;  %s3450_s7 = inlined_call_operand.vmem [shape: f32[2,1,32], index: 7, kind: input, shape index: {}]   ;;  %s3451_s8 = inlined_call_operand.vmem [shape: f32[2,1,32], index: 8, kind: input, shape index: {}]   ;;  %s3452_s9 = inlined_call_operand.vmem [shape: bf16[2,32,64], index: 9, kind: input, shape index: {}]   ;;  %s3453_s10 = inlined_call_operand.vmem [shape: f32[2,1,64], index: 10, kind: input, shape index: {}]   ;;  %s3454_s11 = inlined_call_operand.vmem [shape: bf16[2,64,32], index: 11, kind: input, shape index: {}]   ;;  %s3455_s12 = inlined_call_operand.vmem [shape: f32[2,1,32], index: 12, kind: input, shape index: {}]   ;;  %s3456_s13 = inlined_call_operand.hbm [shape: f32[16,32], index: 13, kind: output, shape index: {}]  }
   0x1   :  { %v2837_v0 = vld [vmem:[%s3443_s0] sm:$0xff]  ;;  %v2844_v2 = vld [vmem:[%s3443_s0 + $0x8] sm:$0xff] }
   0x2   :  { %v53_v1 = vsel %vm52_vm0, %v2837_v0, 0.0 }
   0x3   :  { %54 = vadd.xlane.f32.xlu0 %v53_v1 }
   0x4   :  { %18 = vsyncpa [#allocation3], 0  ;;  %v56_v3 = vsel %vm52_vm0, %v2844_v2, 0.0  ;;  %v2759_v4 = vmov 32.0   ;;  %v2141_v23 = vld [vmem:[%s3447_s4 + $0x10] sm:$0xf] }
   0x5   :  { %2641 = vrcp.f32 %v2759_v4  ;;  %v2549_v24 = vld [vmem:[%s3447_s4 + $0x14] sm:$0xf0]  ;;  %v2548_v25 = vld [vmem:[%s3447_s4 + $0x14] sm:$0xf]  ;;  %v2143_v27 = vld [vmem:[%s3447_s4 + $0x18] sm:$0xf0] }
   0x6   :  { %v2142_v26 = vor.u32 %v2549_v24, %v2141_v23  ;;  %v2159_v28 = vld [vmem:[%s3447_s4 + $0x30] sm:$0xf]  ;;  %v2553_v29 = vld [vmem:[%s3447_s4 + $0x34] sm:$0xf0]  ;;  %v2146_v31 = vor.u32 %v2548_v25, %v2143_v27  ;;  %v2552_v33 = vld [vmem:[%s3447_s4 + $0x34] sm:$0xf] }
   0x7   :  { %v2160_v32 = vor.u32 %v2553_v29, %v2159_v28  ;;  %v2161_v34 = vld [vmem:[%s3447_s4 + $0x38] sm:$0xf0]  ;;  %v2133_v36 = vld [vmem:[%s3447_s4] sm:$0xf]  ;;  %v2547_v37 = vld [vmem:[%s3447_s4 + $0x4] sm:$0xf0] }
   0x8   :  { %166 = vmatpush.bf16.msra.mxu0 %v2142_v26  ;;  %v2164_v35 = vor.u32 %v2552_v33, %v2161_v34  ;;  %180 = vmatpush.bf16.msra.mxu1 %v2146_v31  ;;  %v2546_v38 = vld [vmem:[%s3447_s4 + $0x4] sm:$0xf]  ;;  %v2134_v39 = vor.u32 %v2547_v37, %v2133_v36  ;;  %v2135_v40 = vld [vmem:[%s3447_s4 + $0x8] sm:$0xf0]  ;;  %v2151_v41 = vld [vmem:[%s3447_s4 + $0x20] sm:$0xf] }
   0x9   :  { %214 = vmatpush.bf16.msra.mxu2 %v2160_v32  ;;  %v2551_v42 = vld [vmem:[%s3447_s4 + $0x24] sm:$0xf0]  ;;  %v2138_v43 = vor.u32 %v2546_v38, %v2135_v40  ;;  %v2550_v45 = vld [vmem:[%s3447_s4 + $0x24] sm:$0xf]  ;;  %v2153_v46 = vld [vmem:[%s3447_s4 + $0x28] sm:$0xf0] }
   0xa   :  { %228 = vmatpush.bf16.msra.mxu3 %v2164_v35  ;;  %v2152_v44 = vor.u32 %v2551_v42, %v2151_v41  ;;  %v2156_v48 = vor.u32 %v2550_v45, %v2153_v46  ;;  %v2177_v53 = vld [vmem:[%s3447_s4 + $0x50] sm:$0xf]  ;;  %v2557_v54 = vld [vmem:[%s3447_s4 + $0x54] sm:$0xf0]  ;;  %v2556_v55 = vld [vmem:[%s3447_s4 + $0x54] sm:$0xf] }
   0xb   :  { %57 = vadd.xlane.f32.xlu0 %v56_v3  ;;  %v2642_v5 = vpop.eup %2641  ;;  %v2178_v56 = vor.u32 %v2557_v54, %v2177_v53  ;;  %v2179_v57 = vld [vmem:[%s3447_s4 + $0x58] sm:$0xf0]  ;;  %v2195_v58 = vld [vmem:[%s3447_s4 + $0x70] sm:$0xf]  ;;  %v2561_v61 = vld [vmem:[%s3447_s4 + $0x74] sm:$0xf0] }
   0xc   :  { %v60_v6 = vmul.f32 32.0, %v2642_v5  ;;  %vm64_vm1 = vweird.f32 %v2642_v5  ;;  %167 = vmatpush.bf16.msra.mxu0 %v2134_v39  ;;  %181 = vmatpush.bf16.msra.mxu1 %v2138_v43  ;;  %v2182_v60 = vor.u32 %v2556_v55, %v2179_v57  ;;  %v2560_v62 = vld [vmem:[%s3447_s4 + $0x74] sm:$0xf]  ;;  %v2197_v63 = vld [vmem:[%s3447_s4 + $0x78] sm:$0xf0]  ;;  %v2196_v1 = vor.u32 %v2561_v61, %v2195_v58  ;;  %v2562_v46 = vld [vmem:[%s3448_s5] sm:$0xff] }
   0xd   :  { %215 = vmatpush.bf16.msra.mxu2 %v2152_v44  ;;  %v2200_v3 = vor.u32 %v2560_v62, %v2197_v63  ;;  %v2169_v4 = vld [vmem:[%s3447_s4 + $0x40] sm:$0xf]  ;;  %v2564_v42 = vld [vmem:[%s3448_s5 + $0x10] sm:$0xff]  ;;  %v2569_v43 = vld [vmem:[%s3448_s5 + $0x38] sm:$0xff]  ;;  %vm409_vm8 = vcmask 523264   ;;  %s2760_s21 = smov 64  }
   0xe   :  { %v61_v7 = vsub.f32 1.0, %v60_v6  ;;  %229 = vmatpush.bf16.msra.mxu3 %v2156_v48  ;;  %v2554_v6 = vld [vmem:[%s3447_s4 + $0x44] sm:$0xf]  ;;  %v2627_v26 = vld [vmem:[%s3445_s2] ss:$0 sm:$0xff]  ;;  %v2563_v44 = vld [vmem:[%s3448_s5 + $0x8] sm:$0xff] }
   0xf   :  { %v2568_v45 = vld [vmem:[%s3448_s5 + $0x30] sm:$0xff]  ;;  %v2573_v48 = vld [vmem:[%s3448_s5 + $0x58] sm:$0xff]  ;;  %v2570_v54 = vld [vmem:[%s3448_s5 + $0x40] sm:$0xff]  ;;  %vm673_vm9 = vcmask 130048   ;;  %s2761_s19 = smov [#allocation2]   ;;  %s2763_s23 = smov 8  }
  0x10   :  { %v62_v8 = vmul.f32 %v2642_v5, %v61_v7  ;;  %262 = vmatpush.bf16.msrb.mxu0 %v2178_v56  ;;  %276 = vmatpush.bf16.msrb.mxu1 %v2182_v60  ;;  %v2576_v53 = vld [vmem:[%s3448_s5 + $0x70] sm:$0xff]  ;;  %v2575_v55 = vld [vmem:[%s3448_s5 + $0x68] sm:$0xff]  ;;  %v2574_v58 = vld [vmem:[%s3448_s5 + $0x60] sm:$0xff]  ;;  %s2117_s20 = sshll.u32 %s2761_s19, 4  ;;  %s2118_s20 = int_to_ptr.vmem [resolvable:$true] %s2117_s20 }
  0x11   :  { %310 = vmatpush.bf16.msrb.mxu2 %v2196_v1 }
  0x12   :  { %v63_v9 = vadd.f32 %v2642_v5, %v62_v8  ;;  %324 = vmatpush.bf16.msrb.mxu3 %v2200_v3 }
  0x14   :  { %v2848_v10 = vsel %vm64_vm1, %v2642_v5, %v63_v9  ;;  %v2555_v5 = vld [vmem:[%s3447_s4 + $0x44] sm:$0xf0]  ;;  %v2171_v9 = vld [vmem:[%s3447_s4 + $0x48] sm:$0xf0] }
  0x15   :  { %v2170_v8 = vor.u32 %v2555_v5, %v2169_v4 }
  0x17   :  { %263 = vmatpush.bf16.msrb.mxu0 %v2170_v8 }
  0x76   :  { %v55_v11 = vpop.xlane.xlu0 %54 }
  0x77   :  { %v66_v12 = vmul.f32 %v2848_v10, %v55_v11  ;;  %v2187_v11 = vld [vmem:[%s3447_s4 + $0x60] sm:$0xf] }
  0x79   :  { %v2852_v13 = vsub.f32 %v2837_v0, %v66_v12  ;;  %v2174_v12 = vor.u32 %v2554_v6, %v2171_v9 }
  0x7b   :  { %v70_v14 = vmul.f32 %v2852_v13, %v2852_v13  ;;  %277 = vmatpush.bf16.msrb.mxu1 %v2174_v12 }
  0x7d   :  { %v72_v15 = vsel %vm52_vm0, %v70_v14, 0.0  ;;  %v2559_v14 = vld [vmem:[%s3447_s4 + $0x64] sm:$0xf0] }
  0x7e   :  { %73 = vadd.xlane.f32.xlu1 %v72_v15  ;;  %v58_v16 = vpop.xlane.xlu0 %57  ;;  %v2558_v15 = vld [vmem:[%s3447_s4 + $0x64] sm:$0xf] }
  0x7f   :  { %v67_v17 = vmul.f32 %v2848_v10, %v58_v16  ;;  %v2189_v16 = vld [vmem:[%s3447_s4 + $0x68] sm:$0xf0] }
  0x81   :  { %v2859_v18 = vsub.f32 %v2844_v2, %v67_v17 }
  0x83   :  { %v71_v19 = vmul.f32 %v2859_v18, %v2859_v18 }
  0x85   :  { %v75_v20 = vsel %vm52_vm0, %v71_v19, 0.0  ;;  %v2188_v19 = vor.u32 %v2559_v14, %v2187_v11 }
  0x86   :  { %76 = vadd.xlane.f32.xlu1 %v75_v20  ;;  %v2192_v20 = vor.u32 %v2558_v15, %v2189_v16 }
  0x87   :  { %311 = vmatpush.bf16.msrb.mxu2 %v2188_v19 }
  0x88   :  { %325 = vmatpush.bf16.msrb.mxu3 %v2192_v20 }
  0xf1   :  { %v74_v21 = vpop.xlane.xlu1 %73 }
  0xf2   :  { %v78_v22 = vmul.f32 %v74_v21, %v2848_v10 }
  0xf4   :  { %v2883_v30 = vadd.f32 1e-05, %v78_v22 }
  0xf6   :  { %2643 = vrsqrt.f32 %v2883_v30  ;;  %vm88_vm3 = vweird.f32 %v2883_v30 }
  0xf9   :  { %v77_v47 = vpop.xlane.xlu1 %76 }
  0xfa   :  { %v79_v49 = vmul.f32 %v77_v47, %v2848_v10  ;;  %v2567_v47 = vld [vmem:[%s3448_s5 + $0x28] sm:$0xff] }
  0xfc   :  { %v2644_v50 = vpop.eup %2643  ;;  %v81_v51 = vadd.f32 1e-05, %v79_v49  ;;  %v2566_v49 = vld [vmem:[%s3448_s5 + $0x20] sm:$0xff] }
  0xfd   :  { %v83_v52 = vmul.f32 %v2644_v50, %v2883_v30  ;;  %vm89_vm2 = vweird.f32 %v2644_v50  ;;  %v2628_v30 = vld [vmem:[%s3446_s3] ss:$0 sm:$0xff] }
  0xfe   :  { %2645 = vrsqrt.f32 %v81_v51  ;;  %vm90_vm4 = vmor %vm88_vm3, %vm89_vm2  ;;  %vm98_vm6 = vweird.f32 %v81_v51 }
  0xff   :  { %v84_v59 = vmul.f32 %v2644_v50, %v83_v52  ;;  %v2571_v52 = vld [vmem:[%s3448_s5 + $0x48] sm:$0xff] }
 0x101   :  { %v85_v7 = vmul.f32 0.5, %v84_v59 }
 0x103   :  { %v86_v17 = vsub.f32 1.5, %v85_v7 }
 0x104   :  { %v2646_v21 = vpop.eup %2645 }
 0x105   :  { %v87_v22 = vmul.f32 %v2644_v50, %v86_v17  ;;  %v93_v23 = vmul.f32 %v2646_v21, %v81_v51  ;;  %vm99_vm5 = vweird.f32 %v2646_v21  ;;  %v2577_v51 = vld [vmem:[%s3448_s5 + $0x78] sm:$0xff] }
 0x106   :  { %vm100_vm7 = vmor %vm98_vm6, %vm99_vm5 }
 0x107   :  { %v91_v24 = vsel %vm90_vm4, %v2644_v50, %v87_v22  ;;  %v94_v25 = vmul.f32 %v2646_v21, %v93_v23  ;;  %v2572_v50 = vld [vmem:[%s3448_s5 + $0x50] sm:$0xff] }
 0x108   :  { %v102_v27 = vmul.f32 %v91_v24, %v2852_v13 }
 0x109   :  { %v95_v28 = vmul.f32 0.5, %v94_v25 }
 0x10a   :  { %v107_v31 = vmul.f32 %v2627_v26, %v102_v27 }
 0x10b   :  { %v96_v29 = vsub.f32 1.5, %v95_v28 }
 0x10c   :  { %v112_v34 = vadd.f32 %v2628_v30, %v107_v31 }
 0x10d   :  { %v97_v32 = vmul.f32 %v2646_v21, %v96_v29 }
 0x10e   :  { %v114_v37 = vpack.c.bf16 %v112_v34, %v112_v34 }
 0x10f   :  { %v101_v33 = vsel %vm100_vm7, %v2646_v21, %v97_v32 }
 0x110   :  { %v103_v35 = vmul.f32 %v101_v33, %v2859_v18  ;;  %v134_v13 = vunpack.c.l.b16 %v114_v37  ;;  %v2565_v18 = vld [vmem:[%s3448_s5 + $0x18] sm:$0xff] }
 0x112   :  { %v108_v36 = vmul.f32 %v2627_v26, %v103_v35 }
 0x114   :  { %v113_v38 = vadd.f32 %v2628_v30, %v108_v36 }
 0x116   :  { %v115_v39 = vpack.c.bf16 %v113_v38, %v113_v38 }
 0x118   :  { %v135_v40 = vunpack.c.l.b16 %v115_v39 }
 0x11a   :  { %v136_v41 = vpack.c.b16 %v135_v40, %v134_v13 }
 0x11c   :  { %2147 = vmatmul.msk.bf16.vlgmr.msra.gmra.mxu0 %vm52_vm0, %v136_v41  ;;  %2148 = vmatmul.msk.bf16.vlgmr.msra.gmra.mxu1 %vm52_vm0, %v136_v41 }
 0x11d   :  { %2165 = vmatmul.msk.bf16.vlgmr.msra.gmra.mxu2 %vm52_vm0, %v136_v41  ;;  %2166 = vmatmul.msk.bf16.vlgmr.msra.gmra.mxu3 %vm52_vm0, %v136_v41 }
 0x11e   :  { %417 = vmatpush.bf16.msra.mxu0 %v2565_v18  ;;  %463 = vmatpush.bf16.msra.mxu1 %v2569_v43 }
 0x11f   :  { %509 = vmatpush.bf16.msra.mxu2 %v2573_v48  ;;  %555 = vmatpush.bf16.msra.mxu3 %v2577_v51 }
 0x122   :  { %418 = vmatpush.bf16.msra.mxu0 %v2564_v42  ;;  %464 = vmatpush.bf16.msra.mxu1 %v2568_v45 }
 0x123   :  { %510 = vmatpush.bf16.msra.mxu2 %v2572_v50  ;;  %556 = vmatpush.bf16.msra.mxu3 %v2576_v53 }
 0x126   :  { %419 = vmatpush.bf16.msra.mxu0 %v2563_v44  ;;  %465 = vmatpush.bf16.msra.mxu1 %v2567_v47 }
 0x127   :  { %511 = vmatpush.bf16.msra.mxu2 %v2571_v52  ;;  %557 = vmatpush.bf16.msra.mxu3 %v2575_v55 }
 0x12a   :  { %420 = vmatpush.bf16.msra.mxu0 %v2562_v46  ;;  %466 = vmatpush.bf16.msra.mxu1 %v2566_v49 }
 0x12b   :  { %512 = vmatpush.bf16.msra.mxu2 %v2570_v54  ;;  %558 = vmatpush.bf16.msra.mxu3 %v2574_v58 }
 0x12c   :  { %2183 = vmatmul.msk.bf16.vlgmr.msrb.gmra.mxu0 %vm52_vm0, %v136_v41  ;;  %2184 = vmatmul.msk.bf16.vlgmr.msrb.gmra.mxu1 %vm52_vm0, %v136_v41 }
 0x12d   :  { %2201 = vmatmul.msk.bf16.vlgmr.msrb.gmra.mxu2 %vm52_vm0, %v136_v41  ;;  %2202 = vmatmul.msk.bf16.vlgmr.msrb.gmra.mxu3 %vm52_vm0, %v136_v41 }
 0x199   :  { %v169_v56 = vpop.f32.mrf.mxu0  ;;  %v183_v57 = vpop.f32.mrf.mxu1 }
 0x19a   :  { %v332_v59 = vpack.c.bf16 %v169_v56, %v169_v56  ;;  %v340_v60 = vpack.c.bf16 %v183_v57, %v183_v57 }
 0x19c   :  { %v567_v5 = vunpack.c.l.b16 %v332_v59  ;;  %v382_v6 = vunpack.c.l.b16 %v340_v60 }
 0x1a0   :  { %v217_v61 = vpop.f32.mrf.mxu2  ;;  %v231_v62 = vpop.f32.mrf.mxu3 }
 0x1a1   :  { %v171_v63 = vpop.f32.mrf.mxu0  ;;  %v185_v1 = vpop.f32.mrf.mxu1  ;;  %v334_v12 = vpack.c.bf16 %v217_v61, %v217_v61  ;;  %v342_v14 = vpack.c.bf16 %v231_v62, %v231_v62 }
 0x1a2   :  { %v333_v3 = vpack.c.bf16 %v171_v63, %v171_v63  ;;  %v341_v4 = vpack.c.bf16 %v185_v1, %v185_v1 }
 0x1a3   :  { %v594_v22 = vunpack.c.l.b16 %v334_v12  ;;  %v429_v23 = vunpack.c.l.b16 %v342_v14 }
 0x1a4   :  { %v568_v7 = vunpack.c.l.b16 %v333_v3  ;;  %v383_v8 = vunpack.c.l.b16 %v341_v4 }
 0x1a6   :  { %v3031_v9 = vpack.c.b16 %v568_v7, %v567_v5  ;;  %v384_v11 = vpack.c.b16 %v383_v8, %v382_v6 }
 0x1a8   :  { %v219_v15 = vpop.f32.mrf.mxu2  ;;  %v233_v16 = vpop.f32.mrf.mxu3  ;;  %2219 = vmatmul.msk.bf16.vlgmr.msra.gmra.mxu0 %vm409_vm8, %v384_v11  ;;  %570 = vrot.lane.b32.xlu0 %v3031_v9, %s2760_s21 }
 0x1a9   :  { %v335_v17 = vpack.c.bf16 %v219_v15, %v219_v15  ;;  %v343_v19 = vpack.c.bf16 %v233_v16, %v233_v16  ;;  %v265_v20 = vpop.f32.mrf.mxu0  ;;  %v279_v21 = vpop.f32.mrf.mxu1 }
 0x1aa   :  { %v336_v28 = vpack.c.bf16 %v265_v20, %v265_v20  ;;  %v344_v29 = vpack.c.bf16 %v279_v21, %v279_v21 }
 0x1ab   :  { %v595_v24 = vunpack.c.l.b16 %v335_v17  ;;  %v430_v25 = vunpack.c.l.b16 %v343_v19 }
 0x1ac   :  { %v621_v36 = vunpack.c.l.b16 %v336_v28  ;;  %v475_v37 = vunpack.c.l.b16 %v344_v29  ;;  %v48_v29 = vld [vmem:[%s3444_s1] sm:$0xff] }
 0x1ad   :  { %v596_v26 = vpack.c.b16 %v595_v24, %v594_v22  ;;  %v431_v27 = vpack.c.b16 %v430_v25, %v429_v23 }
 0x1af   :  { %597 = vrot.lane.b32.xlu1 %v596_v26, %s2760_s21  ;;  %2236 = vmatmul.msk.bf16.vlgmr.msra.gmra.mxu1 %vm409_vm8, %v431_v27 }
 0x1b0   :  { %v313_v30 = vpop.f32.mrf.mxu2  ;;  %v327_v31 = vpop.f32.mrf.mxu3 }
 0x1b1   :  { %v267_v32 = vpop.f32.mrf.mxu0  ;;  %v281_v33 = vpop.f32.mrf.mxu1  ;;  %v346_v41 = vpack.c.bf16 %v327_v31, %v327_v31  ;;  %v338_v18 = vpack.c.bf16 %v313_v30, %v313_v30 }
 0x1b2   :  { %v337_v34 = vpack.c.bf16 %v267_v32, %v267_v32  ;;  %v345_v35 = vpack.c.bf16 %v281_v33, %v281_v33 }
 0x1b3   :  { %v521_v46 = vunpack.c.l.b16 %v346_v41  ;;  %v648_v49 = vunpack.c.l.b16 %v338_v18 }
 0x1b4   :  { %v622_v38 = vunpack.c.l.b16 %v337_v34  ;;  %v476_v39 = vunpack.c.l.b16 %v345_v35  ;;  %v49_v34 = vld [vmem:[%s3444_s1 + $0x8] sm:$0xff] }
 0x1b6   :  { %v477_v13 = vpack.c.b16 %v476_v39, %v475_v37  ;;  %v623_v40 = vpack.c.b16 %v622_v38, %v621_v36 }
 0x1b8   :  { %v315_v42 = vpop.f32.mrf.mxu2  ;;  %v329_v43 = vpop.f32.mrf.mxu3  ;;  %2253 = vmatmul.msk.bf16.vlgmr.msra.gmra.mxu2 %vm409_vm8, %v477_v13  ;;  %624 = vrot.lane.b32.xlu2 %v623_v40, %s2760_s21 }
 0x1b9   :  { %v339_v44 = vpack.c.bf16 %v315_v42, %v315_v42  ;;  %v347_v45 = vpack.c.bf16 %v329_v43, %v329_v43 }
 0x1bb   :  { %v649_v47 = vunpack.c.l.b16 %v339_v44  ;;  %v522_v48 = vunpack.c.l.b16 %v347_v45 }
 0x1bd   :  { %v523_v50 = vpack.c.b16 %v522_v48, %v521_v46  ;;  %v650_v51 = vpack.c.b16 %v649_v47, %v648_v49 }
 0x1bf   :  { %2270 = vmatmul.msk.bf16.vlgmr.msra.gmra.mxu3 %vm409_vm8, %v523_v50 }
 0x1c0   :  { %651 = vrot.lane.b32.xlu2 %v650_v51, %s2760_s21 }
 0x212   :  { %v625_v52 = vpop.permute.xlu2 %624 }
 0x213   :  { %v630_v53 = vsel %vm409_vm8, %v625_v52, 0 }
 0x214   :  { %639 = vmatpush.bf16.xpose.msrb.mxu2 %v630_v53 }
 0x21a   :  { %v571_v54 = vpop.permute.xlu0 %570  ;;  %v652_v55 = vpop.permute.xlu2 %651 }
 0x21b   :  { %v576_v56 = vsel %vm409_vm8, %v571_v54, 0  ;;  %v657_v57 = vsel %vm409_vm8, %v652_v55, 0  ;;  %2273 = vmatmul.msk.bf16.vlgmr.msrb.gmra.mxu2 %vm409_vm8, %v623_v40 }
 0x21c   :  { %585 = vmatpush.bf16.xpose.msrb.mxu0 %v576_v56  ;;  %666 = vmatpush.bf16.xpose.msrb.mxu3 %v657_v57 }
 0x221   :  { %v598_v58 = vpop.permute.xlu1 %597 }
 0x222   :  { %v603_v59 = vsel %vm409_vm8, %v598_v58, 0 }
 0x223   :  { %612 = vmatpush.bf16.xpose.msrb.mxu1 %v603_v59  ;;  %2271 = vmatmul.msk.bf16.vlgmr.msrb.gmra.mxu0 %vm409_vm8, %v3031_v9 }
 0x224   :  { %2274 = vmatmul.msk.bf16.vlgmr.msrb.gmra.mxu3 %vm409_vm8, %v650_v51 }
 0x225   :  { %v422_v60 = vpop.f32.mrf.mxu0 }
 0x226   :  { %v770_v61 = vpack.c.bf16 %v422_v60, %v422_v60 }
 0x228   :  { %v785_v3 = vunpack.c.l.b16 %v770_v61 }
 0x22a   :  { %2272 = vmatmul.msk.bf16.vlgmr.msrb.gmra.mxu1 %vm409_vm8, %v596_v26 }
 0x22c   :  { %v468_v62 = vpop.f32.mrf.mxu1 }
 0x22d   :  { %v424_v63 = vpop.f32.mrf.mxu0  ;;  %v772_v6 = vpack.c.bf16 %v468_v62, %v468_v62 }
 0x22e   :  { %v771_v1 = vpack.c.bf16 %v424_v63, %v424_v63 }
 0x22f   :  { %v813_v11 = vunpack.c.l.b16 %v772_v6 }
 0x230   :  { %v786_v4 = vunpack.c.l.b16 %v771_v1 }
 0x232   :  { %v787_v5 = vpack.c.b16 %v786_v4, %v785_v3 }
 0x234   :  { %v470_v7 = vpop.f32.mrf.mxu1  ;;  %799 = vmatpush.bf16.msra.mxu0 %v787_v5 }
 0x235   :  { %v773_v8 = vpack.c.bf16 %v470_v7, %v470_v7 }
 0x237   :  { %v814_v12 = vunpack.c.l.b16 %v773_v8 }
 0x239   :  { %v815_v14 = vpack.c.b16 %v814_v12, %v813_v11 }
 0x23b   :  { %827 = vmatpush.bf16.msra.mxu1 %v815_v14  ;;  %v514_v9 = vpop.f32.mrf.mxu2 }
 0x23c   :  { %v774_v15 = vpack.c.bf16 %v514_v9, %v514_v9 }
 0x23e   :  { %v841_v20 = vunpack.c.l.b16 %v774_v15 }
 0x242   :  { %v560_v16 = vpop.f32.mrf.mxu3 }
 0x243   :  { %v516_v17 = vpop.f32.mrf.mxu2  ;;  %v776_v23 = vpack.c.bf16 %v560_v16, %v560_v16 }
 0x244   :  { %v775_v19 = vpack.c.bf16 %v516_v17, %v516_v17 }
 0x245   :  { %v869_v26 = vunpack.c.l.b16 %v776_v23 }
 0x246   :  { %v842_v21 = vunpack.c.l.b16 %v775_v19 }
 0x248   :  { %v843_v22 = vpack.c.b16 %v842_v21, %v841_v20 }
 0x24a   :  { %v562_v24 = vpop.f32.mrf.mxu3  ;;  %855 = vmatpush.bf16.msra.mxu2 %v843_v22 }
 0x24b   :  { %v777_v25 = vpack.c.bf16 %v562_v24, %v562_v24 }
 0x24d   :  { %v870_v27 = vunpack.c.l.b16 %v777_v25 }
 0x24f   :  { %v871_v28 = vpack.c.b16 %v870_v27, %v869_v26 }
 0x251   :  { %883 = vmatpush.bf16.msra.mxu3 %v871_v28 }
 0x29e   :  { %v641_v30 = vpop.f32.mrf.mxu2 }
 0x29f   :  { %v642_v31 = vadd.f32 %v641_v30, %v48_v29 }
 0x2a0   :  { %v587_v32 = vpop.f32.mrf.mxu0 }
 0x2a1   :  { %v686_v33 = vsel %vm673_vm9, %v642_v31, -inf  ;;  %v588_v35 = vadd.f32 %v587_v32, %v48_v29 }
 0x2a2   :  { %687 = vmax.xlane.f32.xlu2 %v686_v33 }
 0x2a3   :  { %v674_v40 = vsel %vm673_vm9, %v588_v35, -inf }
 0x2a6   :  { %v643_v36 = vpop.f32.mrf.mxu2 }
 0x2a7   :  { %v644_v37 = vadd.f32 %v643_v36, %v49_v34  ;;  %v668_v38 = vpop.f32.mrf.mxu3  ;;  %v614_v41 = vpop.f32.mrf.mxu1 }
 0x2a8   :  { %v669_v39 = vadd.f32 %v668_v38, %v48_v29  ;;  %v589_v18 = vpop.f32.mrf.mxu0  ;;  %v615_v43 = vadd.f32 %v614_v41, %v48_v29 }
 0x2a9   :  { %v689_v13 = vsel %vm673_vm9, %v644_v37, -inf  ;;  %v590_v44 = vadd.f32 %v589_v18, %v49_v34 }
 0x2aa   :  { %690 = vmax.xlane.f32.xlu0 %v689_v13  ;;  %675 = vmax.xlane.f32.xlu2 %v674_v40  ;;  %v692_v42 = vsel %vm673_vm9, %v669_v39, -inf  ;;  %v680_v45 = vsel %vm673_vm9, %v615_v43, -inf }
 0x2ab   :  { %693 = vmax.xlane.f32.xlu1 %v692_v42  ;;  %v677_v46 = vsel %vm673_vm9, %v590_v44, -inf }
 0x2af   :  { %v670_v47 = vpop.f32.mrf.mxu3  ;;  %v616_v50 = vpop.f32.mrf.mxu1 }
 0x2b0   :  { %v671_v48 = vadd.f32 %v670_v47, %v49_v34  ;;  %v617_v51 = vadd.f32 %v616_v50, %v49_v34 }
 0x2b2   :  { %681 = vmax.xlane.f32.xlu0 %v680_v45  ;;  %678 = vmax.xlane.f32.xlu2 %v677_v46  ;;  %v695_v49 = vsel %vm673_vm9, %v671_v48, -inf  ;;  %v683_v52 = vsel %vm673_vm9, %v617_v51, -inf }
 0x2ba   :  { %696 = vmax.xlane.f32.xlu2 %v695_v49 }
 0x2c2   :  { %684 = vmax.xlane.f32.xlu2 %v683_v52 }
 0x315   :  { %v688_v53 = vpop.xlane.xlu2 %687 }
 0x316   :  { %v702_v54 = vsub.f32 %v642_v31, %v688_v53 }
 0x318   :  { %v714_v55 = vmul.f32 1.442695, %v702_v54 }
 0x31a   :  { %2647 = vpow2.f32 %v714_v55 }
 0x31d   :  { %v676_v56 = vpop.xlane.xlu2 %675  ;;  %v691_v59 = vpop.xlane.xlu0 %690 }
 0x31e   :  { %v694_v57 = vpop.xlane.xlu1 %693  ;;  %v698_v58 = vsub.f32 %v588_v35, %v676_v56  ;;  %v703_v3 = vsub.f32 %v644_v37, %v691_v59 }
 0x31f   :  { %v704_v60 = vsub.f32 %v669_v39, %v694_v57 }
 0x320   :  { %v2648_v61 = vpop.eup %2647  ;;  %v706_v62 = vmul.f32 1.442695, %v698_v58  ;;  %v716_v5 = vmul.f32 1.442695, %v703_v3 }
 0x321   :  { %v718_v63 = vmul.f32 1.442695, %v704_v60  ;;  %v734_v1 = vsel %vm673_vm9, %v2648_v61, 0.0 }
 0x322   :  { %735 = vadd.xlane.f32.xlu1 %v734_v1 }
 0x323   :  { %2649 = vpow2.f32 %v718_v63 }
 0x324   :  { %2651 = vpow2.f32 %v706_v62 }
 0x325   :  { %v679_v4 = vpop.xlane.xlu2 %678  ;;  %2653 = vpow2.f32 %v716_v5  ;;  %v682_v9 = vpop.xlane.xlu0 %681 }
 0x326   :  { %v699_v6 = vsub.f32 %v590_v44, %v679_v4  ;;  %v700_v19 = vsub.f32 %v615_v43, %v682_v9 }
 0x328   :  { %v708_v7 = vmul.f32 1.442695, %v699_v6  ;;  %v710_v24 = vmul.f32 1.442695, %v700_v19 }
 0x329   :  { %v2650_v8 = vpop.eup %2649 }
 0x32a   :  { %v2652_v11 = vpop.eup %2651  ;;  %v740_v12 = vsel %vm673_vm9, %v2650_v8, 0.0  ;;  %2655 = vpow2.f32 %v708_v7 }
 0x32b   :  { %741 = vadd.xlane.f32.xlu2 %v740_v12  ;;  %v722_v14 = vsel %vm673_vm9, %v2652_v11, 0.0  ;;  %v2654_v17 = vpop.eup %2653 }
 0x32c   :  { %723 = vadd.xlane.f32.xlu0 %v722_v14  ;;  %v737_v23 = vsel %vm673_vm9, %v2654_v17, 0.0 }
 0x32d   :  { %v697_v15 = vpop.xlane.xlu2 %696 }
 0x32e   :  { %v705_v16 = vsub.f32 %v671_v48, %v697_v15 }
 0x330   :  { %v720_v20 = vmul.f32 1.442695, %v705_v16  ;;  %v2656_v21 = vpop.eup %2655 }
 0x331   :  { %v725_v22 = vsel %vm673_vm9, %v2656_v21, 0.0 }
 0x332   :  { %2657 = vpow2.f32 %v720_v20 }
 0x333   :  { %726 = vadd.xlane.f32.xlu2 %v725_v22  ;;  %2659 = vpow2.f32 %v710_v24 }
 0x334   :  { %738 = vadd.xlane.f32.xlu0 %v737_v23 }
 0x335   :  { %v685_v25 = vpop.xlane.xlu2 %684 }
 0x336   :  { %v701_v26 = vsub.f32 %v617_v51, %v685_v25 }
 0x338   :  { %v2658_v27 = vpop.eup %2657  ;;  %v712_v28 = vmul.f32 1.442695, %v701_v26 }
 0x339   :  { %v743_v29 = vsel %vm673_vm9, %v2658_v27, 0.0  ;;  %v2660_v30 = vpop.eup %2659 }
 0x33a   :  { %2661 = vpow2.f32 %v712_v28  ;;  %744 = vadd.xlane.f32.xlu1 %v743_v29  ;;  %v728_v32 = vsel %vm673_vm9, %v2660_v30, 0.0  ;;  %v2629_v29 = vld [vmem:[%s3449_s6] ss:$0 sm:$0xff] }
 0x340   :  { %v2662_v31 = vpop.eup %2661 }
 0x341   :  { %v731_v33 = vsel %vm673_vm9, %v2662_v31, 0.0 }
 0x342   :  { %729 = vadd.xlane.f32.xlu1 %v728_v32  ;;  %732 = vadd.xlane.f32.xlu0 %v731_v33 }
 0x395   :  { %v736_v35 = vpop.xlane.xlu1 %735 }
 0x39e   :  { %v742_v34 = vpop.xlane.xlu2 %741 }
 0x39f   :  { %v724_v36 = vpop.xlane.xlu0 %723 }
 0x3a0   :  { %2663 = vrcp.f32 %v724_v36 }
 0x3a1   :  { %2665 = vrcp.f32 %v736_v35 }
 0x3a2   :  { %2667 = vrcp.f32 %v742_v34 }
 0x3a6   :  { %v727_v37 = vpop.xlane.xlu2 %726  ;;  %v2664_v38 = vpop.eup %2663 }
 0x3a7   :  { %v739_v39 = vpop.xlane.xlu0 %738  ;;  %2669 = vrcp.f32 %v727_v37  ;;  %v2666_v13 = vpop.eup %2665  ;;  %v754_v40 = vmul.f32 %v2664_v38, %v2652_v11 }
 0x3a8   :  { %2671 = vrcp.f32 %v739_v39  ;;  %v758_v41 = vmul.f32 %v2666_v13, %v2648_v61  ;;  %v2668_v18 = vpop.eup %2667 }
 0x3a9   :  { %v762_v45 = vpack.c.bf16 %v754_v40, %v754_v40  ;;  %v760_v50 = vmul.f32 %v2668_v18, %v2650_v8 }
 0x3aa   :  { %v766_v47 = vpack.c.bf16 %v758_v41, %v758_v41 }
 0x3ab   :  { %v780_v52 = vunpack.c.l.b16 %v762_v45  ;;  %v768_v58 = vpack.c.bf16 %v760_v50, %v760_v50 }
 0x3ac   :  { %v836_v54 = vunpack.c.l.b16 %v766_v47 }
 0x3ad   :  { %v2670_v42 = vpop.eup %2669  ;;  %v745_v43 = vpop.xlane.xlu1 %744  ;;  %v864_v1 = vunpack.c.l.b16 %v768_v58 }
 0x3ae   :  { %v2672_v44 = vpop.eup %2671  ;;  %v755_v46 = vmul.f32 %v2670_v42, %v2656_v21  ;;  %2673 = vrcp.f32 %v745_v43 }
 0x3af   :  { %v759_v48 = vmul.f32 %v2672_v44, %v2654_v17 }
 0x3b0   :  { %v763_v49 = vpack.c.bf16 %v755_v46, %v755_v46 }
 0x3b1   :  { %v767_v51 = vpack.c.bf16 %v759_v48, %v759_v48 }
 0x3b2   :  { %v781_v53 = vunpack.c.l.b16 %v763_v49 }
 0x3b3   :  { %v837_v55 = vunpack.c.l.b16 %v767_v51 }
 0x3b4   :  { %v2674_v56 = vpop.eup %2673  ;;  %v782_v57 = vpack.c.b16 %v781_v53, %v780_v52  ;;  %v2579_v52 = vld [vmem:[%s3452_s9 + $0x8] sm:$0xff] }
 0x3b5   :  { %v838_v59 = vpack.c.b16 %v837_v55, %v836_v54  ;;  %v761_v60 = vmul.f32 %v2674_v56, %v2658_v27  ;;  %v730_v61 = vpop.xlane.xlu1 %729  ;;  %v733_v62 = vpop.xlane.xlu0 %732  ;;  %998 = vmatpush.bf16.msrb.mxu0 %v2579_v52  ;;  %v2578_v56 = vld [vmem:[%s3452_s9] sm:$0xff] }
 0x3b6   :  { %2675 = vrcp.f32 %v730_v61  ;;  %2275 = vmatmul.msk.bf16.vlgmr.msra.gmra.mxu0 %vm673_vm9, %v782_v57 }
 0x3b7   :  { %v769_v63 = vpack.c.bf16 %v761_v60, %v761_v60  ;;  %2277 = vmatmul.msk.bf16.vlgmr.msra.gmra.mxu2 %vm673_vm9, %v838_v59  ;;  %2677 = vrcp.f32 %v733_v62 }
 0x3b9   :  { %v865_v3 = vunpack.c.l.b16 %v769_v63  ;;  %999 = vmatpush.bf16.msrb.mxu0 %v2578_v56 }
 0x3bb   :  { %v866_v4 = vpack.c.b16 %v865_v3, %v864_v1 }
 0x3bc   :  { %v2676_v5 = vpop.eup %2675 }
 0x3bd   :  { %v2678_v6 = vpop.eup %2677  ;;  %v756_v7 = vmul.f32 %v2676_v5, %v2660_v30  ;;  %2278 = vmatmul.msk.bf16.vlgmr.msra.gmra.mxu3 %vm673_vm9, %v866_v4 }
 0x3be   :  { %v757_v8 = vmul.f32 %v2678_v6, %v2662_v31 }
 0x3bf   :  { %v764_v11 = vpack.c.bf16 %v756_v7, %v756_v7 }
 0x3c0   :  { %v765_v12 = vpack.c.bf16 %v757_v8, %v757_v8 }
 0x3c1   :  { %v808_v14 = vunpack.c.l.b16 %v764_v11 }
 0x3c2   :  { %v809_v9 = vunpack.c.l.b16 %v765_v12  ;;  %v2630_v12 = vld [vmem:[%s3450_s7] ss:$0 sm:$0xff] }
 0x3c4   :  { %v810_v15 = vpack.c.b16 %v809_v9, %v808_v14 }
 0x3c6   :  { %2276 = vmatmul.msk.bf16.vlgmr.msra.gmra.mxu1 %vm673_vm9, %v810_v15 }
 0x433   :  { %v801_v16 = vpop.f32.mrf.mxu0 }
 0x434   :  { %v890_v21 = vsel %vm52_vm0, %v801_v16, 0.0  ;;  %v2631_v16 = vld [vmem:[%s3451_s8] ss:$0 sm:$0xff] }
 0x43a   :  { %v857_v17 = vpop.f32.mrf.mxu2 }
 0x43b   :  { %v893_v24 = vsel %vm52_vm0, %v857_v17, 0.0  ;;  %v803_v27 = vpop.f32.mrf.mxu0 }
 0x43c   :  { %v897_v33 = vsel %vm52_vm0, %v803_v27, 0.0  ;;  %v2580_v27 = vld [vmem:[%s3454_s11] sm:$0xff] }
 0x440   :  { %v885_v19 = vpop.f32.mrf.mxu3 }
 0x441   :  { %v895_v26 = vsel %vm52_vm0, %v885_v19, 0.0 }
 0x442   :  { %v859_v30 = vpop.f32.mrf.mxu2 }
 0x443   :  { %v829_v20 = vpop.f32.mrf.mxu1  ;;  %v900_v38 = vsel %vm52_vm0, %v859_v30, 0.0 }
 0x444   :  { %v891_v22 = vsel %vm52_vm0, %v829_v20, 0.0 }
 0x445   :  { %v892_v23 = vadd.f32 %v891_v22, %v890_v21 }
 0x447   :  { %v894_v25 = vadd.f32 %v893_v24, %v892_v23  ;;  %v2583_v24 = vld [vmem:[%s3454_s11 + $0x18] sm:$0xff] }
 0x448   :  { %v887_v35 = vpop.f32.mrf.mxu3  ;;  %1068 = vmatpush.bf16.msrb.mxu1 %v2583_v24  ;;  %v2585_v24 = vld [vmem:[%s3447_s4 + $0x84] sm:$0xf0] }
 0x449   :  { %v896_v28 = vadd.f32 %v895_v26, %v894_v25  ;;  %v902_v40 = vsel %vm52_vm0, %v887_v35, 0.0  ;;  %v2582_v25 = vld [vmem:[%s3454_s11 + $0x10] sm:$0xff]  ;;  %v2581_v26 = vld [vmem:[%s3454_s11 + $0x8] sm:$0xff] }
 0x44b   :  { %v831_v31 = vpop.f32.mrf.mxu1  ;;  %v904_v32 = vadd.f32 %v896_v28, %v2837_v0  ;;  %v2632_v28 = vld [vmem:[%s3453_s10] ss:$0 sm:$0xff] }
 0x44c   :  { %v898_v34 = vsel %vm52_vm0, %v831_v31, 0.0  ;;  %1069 = vmatpush.bf16.msrb.mxu1 %v2582_v25  ;;  %v2584_v25 = vld [vmem:[%s3447_s4 + $0x84] sm:$0xf] }
 0x44d   :  { %v899_v36 = vadd.f32 %v898_v34, %v897_v33  ;;  %v3087_v37 = vadd.f32 %v2629_v29, %v904_v32 }
 0x44f   :  { %v901_v39 = vadd.f32 %v900_v38, %v899_v36  ;;  %v914_v13 = vsel %vm52_vm0, %v3087_v37, 0.0 }
 0x450   :  { %915 = vadd.xlane.f32.xlu2 %v914_v13  ;;  %1070 = vmatpush.bf16.msrb.mxu1 %v2581_v26 }
 0x451   :  { %v903_v41 = vadd.f32 %v902_v40, %v901_v39 }
 0x453   :  { %v905_v0 = vadd.f32 %v903_v41, %v2844_v2 }
 0x454   :  { %1071 = vmatpush.bf16.msrb.mxu1 %v2580_v27  ;;  %v2327_v27 = vld [vmem:[%s3447_s4 + $0x88] sm:$0xf0] }
 0x455   :  { %v3094_v18 = vadd.f32 %v2629_v29, %v905_v0 }
 0x457   :  { %v917_v42 = vsel %vm52_vm0, %v3094_v18, 0.0 }
 0x458   :  { %918 = vadd.xlane.f32.xlu1 %v917_v42 }
 0x4c3   :  { %v916_v43 = vpop.xlane.xlu2 %915 }
 0x4c4   :  { %v920_v44 = vmul.f32 %v916_v43, %v2848_v10 }
 0x4c6   :  { %v922_v45 = vsub.f32 %v3087_v37, %v920_v44 }
 0x4c8   :  { %v924_v46 = vmul.f32 %v922_v45, %v922_v45 }
 0x4ca   :  { %v926_v47 = vsel %vm52_vm0, %v924_v46, 0.0 }
 0x4cb   :  { %927 = vadd.xlane.f32.xlu0 %v926_v47  ;;  %v919_v48 = vpop.xlane.xlu1 %918 }
 0x4cc   :  { %v921_v49 = vmul.f32 %v919_v48, %v2848_v10 }
 0x4ce   :  { %v923_v2 = vsub.f32 %v3094_v18, %v921_v49 }
 0x4d0   :  { %v925_v50 = vmul.f32 %v923_v2, %v923_v2 }
 0x4d2   :  { %v929_v51 = vsel %vm52_vm0, %v925_v50, 0.0  ;;  %v2633_v50 = vld [vmem:[%s3455_s12] ss:$0 sm:$0xff] }
 0x4d3   :  { %930 = vadd.xlane.f32.xlu2 %v929_v51 }
 0x53e   :  { %v928_v53 = vpop.xlane.xlu0 %927 }
 0x53f   :  { %v932_v54 = vmul.f32 %v928_v53, %v2848_v10 }
 0x541   :  { %v934_v55 = vadd.f32 1e-05, %v932_v54 }
 0x543   :  { %2679 = vrsqrt.f32 %v934_v55  ;;  %vm942_vm11 = vweird.f32 %v934_v55 }
 0x546   :  { %v931_v57 = vpop.xlane.xlu2 %930 }
 0x547   :  { %v933_v58 = vmul.f32 %v931_v57, %v2848_v10 }
 0x549   :  { %v2680_v59 = vpop.eup %2679  ;;  %v935_v60 = vadd.f32 1e-05, %v933_v58 }
 0x54a   :  { %v937_v61 = vmul.f32 %v2680_v59, %v934_v55  ;;  %vm943_vm10 = vweird.f32 %v2680_v59 }
 0x54b   :  { %2681 = vrsqrt.f32 %v935_v60  ;;  %vm944_vm12 = vmor %vm942_vm11, %vm943_vm10  ;;  %vm952_vm14 = vweird.f32 %v935_v60 }
 0x54c   :  { %v938_v62 = vmul.f32 %v2680_v59, %v937_v61 }
 0x54e   :  { %v939_v63 = vmul.f32 0.5, %v938_v62 }
 0x550   :  { %v940_v1 = vsub.f32 1.5, %v939_v63 }
 0x551   :  { %v2682_v3 = vpop.eup %2681 }
 0x552   :  { %v941_v4 = vmul.f32 %v2680_v59, %v940_v1  ;;  %v947_v5 = vmul.f32 %v2682_v3, %v935_v60  ;;  %vm953_vm13 = vweird.f32 %v2682_v3 }
 0x553   :  { %vm954_vm15 = vmor %vm952_vm14, %vm953_vm13 }
 0x554   :  { %v948_v6 = vmul.f32 %v2682_v3, %v947_v5  ;;  %v945_v7 = vsel %vm944_vm12, %v2680_v59, %v941_v4 }
 0x555   :  { %v956_v14 = vmul.f32 %v945_v7, %v922_v45  ;;  %v2333_v7 = vld [vmem:[%s3447_s4 + $0x90] sm:$0xf] }
 0x556   :  { %v949_v8 = vmul.f32 0.5, %v948_v6 }
 0x557   :  { %v961_v17 = vmul.f32 %v2630_v12, %v956_v14 }
 0x558   :  { %v950_v11 = vsub.f32 1.5, %v949_v8  ;;  %v2587_v8 = vld [vmem:[%s3447_s4 + $0x94] sm:$0xf0] }
 0x559   :  { %v966_v21 = vadd.f32 %v2631_v16, %v961_v17  ;;  %v2334_v14 = vor.u32 %v2587_v8, %v2333_v7  ;;  %v2591_v17 = vld [vmem:[%s3447_s4 + $0xb4] sm:$0xf0] }
 0x55a   :  { %v951_v9 = vmul.f32 %v2682_v3, %v950_v11  ;;  %v2586_v11 = vld [vmem:[%s3447_s4 + $0x94] sm:$0xf] }
 0x55b   :  { %1191 = vmatpush.bf16.msrb.mxu2 %v2334_v14  ;;  %v2634_v14 = vld [vmem:[%s3445_s2 + $0x1] ss:$0 sm:$0xff] }
 0x55c   :  { %v955_v15 = vsel %vm954_vm15, %v2682_v3, %v951_v9  ;;  %v2335_v9 = vld [vmem:[%s3447_s4 + $0x98] sm:$0xf0] }
 0x55d   :  { %v957_v19 = vmul.f32 %v955_v15, %v923_v2  ;;  %v2351_v15 = vld [vmem:[%s3447_s4 + $0xb0] sm:$0xf] }
 0x55f   :  { %v962_v20 = vmul.f32 %v2630_v12, %v957_v19  ;;  %v2590_v19 = vld [vmem:[%s3447_s4 + $0xb4] sm:$0xf] }
 0x561   :  { %v967_v22 = vadd.f32 %v2631_v16, %v962_v20  ;;  %v2338_v16 = vor.u32 %v2586_v11, %v2335_v9  ;;  %v2353_v20 = vld [vmem:[%s3447_s4 + $0xb8] sm:$0xf0] }
 0x563   :  { %v968_v23 = vpack.c.bf16 %v967_v22, %v966_v21  ;;  %v2352_v21 = vor.u32 %v2591_v17, %v2351_v15  ;;  %v2356_v22 = vor.u32 %v2590_v19, %v2353_v20  ;;  %1205 = vmatpush.bf16.msrb.mxu3 %v2338_v16 }
 0x565   :  { %2287 = vmatmul.msk.bf16.vlgmr.msrb.gmra.mxu0 %vm52_vm0, %v968_v23  ;;  %v2325_v23 = vld [vmem:[%s3447_s4 + $0x80] sm:$0xf]  ;;  %1253 = vmatpush.bf16.msra.mxu1 %v2356_v22 }
 0x566   :  { %1239 = vmatpush.bf16.msra.mxu0 %v2352_v21  ;;  %v2326_v26 = vor.u32 %v2585_v24, %v2325_v23 }
 0x568   :  { %1192 = vmatpush.bf16.msrb.mxu2 %v2326_v26 }
 0x5e2   :  { %v1001_v29 = vpop.f32.mrf.mxu0 }
 0x5e3   :  { %v1002_v30 = vadd.f32 %v2632_v28, %v1001_v29  ;;  %v2589_v29 = vld [vmem:[%s3447_s4 + $0xa4] sm:$0xf0] }
 0x5e5   :  { %v1008_v31 = vmul.f32 0.044715, %v1002_v30  ;;  %v1006_v45 = vmul.f32 0.5, %v1002_v30 }
 0x5e7   :  { %v1010_v32 = vmul.f32 %v1008_v31, %v1002_v30  ;;  %v2330_v31 = vor.u32 %v2584_v25, %v2327_v27 }
 0x5e9   :  { %v1012_v33 = vmul.f32 %v1010_v32, %v1002_v30  ;;  %1206 = vmatpush.bf16.msrb.mxu3 %v2330_v31  ;;  %v2605_v31 = vld [vmem:[%s3448_s5 + $0xa8] sm:$0xff] }
 0x5ea   :  { %v1003_v34 = vpop.f32.mrf.mxu0 }
 0x5eb   :  { %v1014_v35 = vadd.f32 %v1012_v33, %v1002_v30  ;;  %v1004_v36 = vadd.f32 %v2632_v28, %v1003_v34  ;;  %v2343_v28 = vld [vmem:[%s3447_s4 + $0xa0] sm:$0xf]  ;;  %v2588_v33 = vld [vmem:[%s3447_s4 + $0xa4] sm:$0xf]  ;;  %v2345_v34 = vld [vmem:[%s3447_s4 + $0xa8] sm:$0xf0] }
 0x5ec   :  { %v2344_v32 = vor.u32 %v2589_v29, %v2343_v28  ;;  %v2606_v29 = vld [vmem:[%s3448_s5 + $0xb0] sm:$0xff] }
 0x5ed   :  { %v1009_v38 = vmul.f32 0.044715, %v1004_v36  ;;  %v1016_v39 = vmul.f32 0.7978846, %v1014_v35  ;;  %v1007_v46 = vmul.f32 0.5, %v1004_v36 }
 0x5ee   :  { %1240 = vmatpush.bf16.msra.mxu0 %v2344_v32  ;;  %v2602_v32 = vld [vmem:[%s3448_s5 + $0x90] sm:$0xff] }
 0x5ef   :  { %v1011_v13 = vmul.f32 %v1009_v38, %v1004_v36  ;;  %2683 = vtanh.f32 %v1016_v39 }
 0x5f1   :  { %v1013_v40 = vmul.f32 %v1011_v13, %v1004_v36 }
 0x5f3   :  { %v1015_v41 = vadd.f32 %v1013_v40, %v1004_v36  ;;  %v2348_v36 = vor.u32 %v2588_v33, %v2345_v34  ;;  %v2369_v40 = vld [vmem:[%s3447_s4 + $0xd0] sm:$0xf]  ;;  %v2604_v33 = vld [vmem:[%s3448_s5 + $0xa0] sm:$0xff]  ;;  %v2601_v34 = vld [vmem:[%s3448_s5 + $0x88] sm:$0xff] }
 0x5f5   :  { %v1017_v0 = vmul.f32 0.7978846, %v1015_v41  ;;  %v2684_v42 = vpop.eup %2683  ;;  %1254 = vmatpush.bf16.msra.mxu1 %v2348_v36  ;;  %v2595_v41 = vld [vmem:[%s3447_s4 + $0xd4] sm:$0xf0]  ;;  %v2600_v36 = vld [vmem:[%s3448_s5 + $0x80] sm:$0xff] }
 0x5f6   :  { %v1020_v43 = vadd.f32 1.0, %v2684_v42  ;;  %v2370_v42 = vor.u32 %v2595_v41, %v2369_v40  ;;  %v2610_v40 = vld [vmem:[%s3448_s5 + $0xd0] sm:$0xff]  ;;  %v2612_v41 = vld [vmem:[%s3448_s5 + $0xe0] sm:$0xff] }
 0x5f7   :  { %2685 = vtanh.f32 %v1017_v0  ;;  %v2594_v0 = vld [vmem:[%s3447_s4 + $0xd4] sm:$0xf] }
 0x5f8   :  { %v1022_v48 = vmul.f32 %v1020_v43, %v1006_v45  ;;  %v2371_v43 = vld [vmem:[%s3447_s4 + $0xd8] sm:$0xf0]  ;;  %1287 = vmatpush.bf16.msra.mxu2 %v2370_v42 }
 0x5fd   :  { %v2686_v44 = vpop.eup %2685 }
 0x5fe   :  { %v1021_v47 = vadd.f32 1.0, %v2686_v44  ;;  %v2387_v44 = vld [vmem:[%s3447_s4 + $0xf0] sm:$0xf] }
 0x600   :  { %v1023_v49 = vmul.f32 %v1021_v47, %v1007_v46  ;;  %v2374_v46 = vor.u32 %v2594_v0, %v2371_v43  ;;  %v2599_v47 = vld [vmem:[%s3447_s4 + $0xf4] sm:$0xf0]  ;;  %v2609_v0 = vld [vmem:[%s3448_s5 + $0xc8] sm:$0xff] }
 0x602   :  { %v1024_v2 = vpack.c.bf16 %v1023_v49, %v1022_v48  ;;  %v2598_v48 = vld [vmem:[%s3447_s4 + $0xf4] sm:$0xf]  ;;  %v2389_v49 = vld [vmem:[%s3447_s4 + $0xf8] sm:$0xf0]  ;;  %1301 = vmatpush.bf16.msra.mxu3 %v2374_v46 }
 0x604   :  { %2304 = vmatmul.msk.bf16.vlgmr.msrb.gmra.mxu1 %vm409_vm8, %v1024_v2  ;;  %v2388_v2 = vor.u32 %v2599_v47, %v2387_v44  ;;  %v2608_v44 = vld [vmem:[%s3448_s5 + $0xc0] sm:$0xff] }
 0x606   :  { %1335 = vmatpush.bf16.msrb.mxu0 %v2388_v2 }
 0x681   :  { %v1073_v51 = vpop.f32.mrf.mxu1 }
 0x682   :  { %v1074_v52 = vadd.f32 %v2633_v50, %v1073_v51  ;;  %v2361_v51 = vld [vmem:[%s3447_s4 + $0xc0] sm:$0xf] }
 0x684   :  { %v3139_v53 = vadd.f32 %v1074_v52, %v3087_v37  ;;  %v2593_v52 = vld [vmem:[%s3447_s4 + $0xc4] sm:$0xf0] }
 0x686   :  { %v1084_v54 = vsel %vm52_vm0, %v3139_v53, 0.0 }
 0x687   :  { %1085 = vadd.xlane.f32.xlu1 %v1084_v54  ;;  %v2592_v54 = vld [vmem:[%s3447_s4 + $0xc4] sm:$0xf] }
 0x689   :  { %v1075_v55 = vpop.f32.mrf.mxu1 }
 0x68a   :  { %v1076_v56 = vadd.f32 %v2633_v50, %v1075_v55  ;;  %v2392_v50 = vor.u32 %v2598_v48, %v2389_v49 }
 0x68c   :  { %v3144_v57 = vadd.f32 %v1076_v56, %v3094_v18  ;;  %v2362_v56 = vor.u32 %v2593_v52, %v2361_v51  ;;  %1349 = vmatpush.bf16.msrb.mxu1 %v2392_v50 }
 0x68e   :  { %v1087_v58 = vsel %vm52_vm0, %v3144_v57, 0.0  ;;  %1288 = vmatpush.bf16.msra.mxu2 %v2362_v56 }
 0x68f   :  { %1088 = vadd.xlane.f32.xlu0 %v1087_v58  ;;  %v2363_v58 = vld [vmem:[%s3447_s4 + $0xc8] sm:$0xf0] }
 0x6fa   :  { %v1086_v59 = vpop.xlane.xlu1 %1085 }
 0x6fb   :  { %v1090_v60 = vmul.f32 %v1086_v59, %v2848_v10  ;;  %v2379_v59 = vld [vmem:[%s3447_s4 + $0xe0] sm:$0xf] }
 0x6fd   :  { %v3150_v61 = vsub.f32 %v3139_v53, %v1090_v60  ;;  %v2366_v60 = vor.u32 %v2592_v54, %v2363_v58 }
 0x6ff   :  { %v1094_v37 = vmul.f32 %v3150_v61, %v3150_v61  ;;  %1302 = vmatpush.bf16.msra.mxu3 %v2366_v60 }
 0x701   :  { %v1096_v62 = vsel %vm52_vm0, %v1094_v37, 0.0  ;;  %v2597_v37 = vld [vmem:[%s3447_s4 + $0xe4] sm:$0xf0] }
 0x702   :  { %v1089_v63 = vpop.xlane.xlu0 %1088  ;;  %1097 = vadd.xlane.f32.xlu2 %v1096_v62  ;;  %v2596_v62 = vld [vmem:[%s3447_s4 + $0xe4] sm:$0xf] }
 0x703   :  { %v1091_v18 = vmul.f32 %v1089_v63, %v2848_v10  ;;  %v2381_v63 = vld [vmem:[%s3447_s4 + $0xe8] sm:$0xf0] }
 0x705   :  { %v3157_v1 = vsub.f32 %v3144_v57, %v1091_v18 }
 0x707   :  { %v1095_v3 = vmul.f32 %v3157_v1, %v3157_v1 }
 0x709   :  { %v1099_v4 = vsel %vm52_vm0, %v1095_v3, 0.0  ;;  %v2380_v3 = vor.u32 %v2597_v37, %v2379_v59 }
 0x70a   :  { %1100 = vadd.xlane.f32.xlu1 %v1099_v4  ;;  %v2384_v4 = vor.u32 %v2596_v62, %v2381_v63 }
 0x70b   :  { %1336 = vmatpush.bf16.msrb.mxu0 %v2380_v3 }
 0x70c   :  { %1350 = vmatpush.bf16.msrb.mxu1 %v2384_v4 }
 0x775   :  { %v1098_v5 = vpop.xlane.xlu2 %1097 }
 0x776   :  { %v1102_v6 = vmul.f32 %v1098_v5, %v2848_v10 }
 0x778   :  { %v3172_v12 = vadd.f32 1e-05, %v1102_v6 }
 0x77a   :  { %2687 = vrsqrt.f32 %v3172_v12  ;;  %vm1112_vm2 = vweird.f32 %v3172_v12 }
 0x77d   :  { %v1101_v30 = vpop.xlane.xlu1 %1100 }
 0x77e   :  { %v1103_v35 = vmul.f32 %v1101_v30, %v2848_v10  ;;  %v2603_v30 = vld [vmem:[%s3448_s5 + $0x98] sm:$0xff] }
 0x780   :  { %v2688_v38 = vpop.eup %2687  ;;  %v1105_v39 = vadd.f32 1e-05, %v1103_v35  ;;  %v2615_v35 = vld [vmem:[%s3448_s5 + $0xf8] sm:$0xff] }
 0x781   :  { %v1107_v13 = vmul.f32 %v2688_v38, %v3172_v12  ;;  %vm1113_vm1 = vweird.f32 %v2688_v38  ;;  %v2635_v12 = vld [vmem:[%s3446_s3 + $0x1] ss:$0 sm:$0xff] }
 0x782   :  { %2689 = vrsqrt.f32 %v1105_v39  ;;  %vm1114_vm3 = vmor %vm1112_vm2, %vm1113_vm1  ;;  %vm1122_vm5 = vweird.f32 %v1105_v39 }
 0x783   :  { %v1108_v45 = vmul.f32 %v2688_v38, %v1107_v13  ;;  %v2613_v13 = vld [vmem:[%s3448_s5 + $0xe8] sm:$0xff] }
 0x785   :  { %v1109_v55 = vmul.f32 0.5, %v1108_v45 }
 0x787   :  { %v1110_v18 = vsub.f32 1.5, %v1109_v55 }
 0x788   :  { %v2690_v5 = vpop.eup %2689 }
 0x789   :  { %v1111_v6 = vmul.f32 %v2688_v38, %v1110_v18  ;;  %v1117_v7 = vmul.f32 %v2690_v5, %v1105_v39  ;;  %vm1123_vm4 = vweird.f32 %v2690_v5  ;;  %v2611_v39 = vld [vmem:[%s3448_s5 + $0xd8] sm:$0xff] }
 0x78a   :  { %vm1124_vm6 = vmor %vm1122_vm5, %vm1123_vm4 }
 0x78b   :  { %v1115_v8 = vsel %vm1114_vm3, %v2688_v38, %v1111_v6  ;;  %v1118_v11 = vmul.f32 %v2690_v5, %v1117_v7  ;;  %v2614_v38 = vld [vmem:[%s3448_s5 + $0xf0] sm:$0xff] }
 0x78c   :  { %v1126_v9 = vmul.f32 %v1115_v8, %v3150_v61 }
 0x78d   :  { %v1119_v15 = vmul.f32 0.5, %v1118_v11 }
 0x78e   :  { %v1131_v17 = vmul.f32 %v2634_v14, %v1126_v9 }
 0x78f   :  { %v1120_v16 = vsub.f32 1.5, %v1119_v15 }
 0x790   :  { %v1136_v21 = vadd.f32 %v2635_v12, %v1131_v17 }
 0x791   :  { %v1121_v19 = vmul.f32 %v2690_v5, %v1120_v16 }
 0x792   :  { %v1138_v24 = vpack.c.bf16 %v1136_v21, %v1136_v21 }
 0x793   :  { %v1125_v20 = vsel %vm1124_vm6, %v2690_v5, %v1121_v19 }
 0x794   :  { %v1127_v22 = vmul.f32 %v1125_v20, %v3157_v1  ;;  %v1159_v61 = vunpack.c.l.b16 %v1138_v24  ;;  %v2607_v1 = vld [vmem:[%s3448_s5 + $0xb8] sm:$0xff] }
 0x796   :  { %v1132_v23 = vmul.f32 %v2634_v14, %v1127_v22 }
 0x798   :  { %v1137_v25 = vadd.f32 %v2635_v12, %v1132_v23 }
 0x79a   :  { %v1139_v26 = vpack.c.bf16 %v1137_v25, %v1137_v25 }
 0x79c   :  { %v1160_v27 = vunpack.c.l.b16 %v1139_v26 }
 0x79e   :  { %v1161_v28 = vpack.c.b16 %v1160_v27, %v1159_v61 }
 0x7a0   :  { %2339 = vmatmul.msk.bf16.vlgmr.msrb.gmra.mxu2 %vm52_vm0, %v1161_v28  ;;  %2340 = vmatmul.msk.bf16.vlgmr.msrb.gmra.mxu3 %vm52_vm0, %v1161_v28 }
 0x7a1   :  { %2357 = vmatmul.msk.bf16.vlgmr.msra.gmra.mxu0 %vm52_vm0, %v1161_v28  ;;  %2358 = vmatmul.msk.bf16.vlgmr.msra.gmra.mxu1 %vm52_vm0, %v1161_v28 }
 0x7a2   :  { %1488 = vmatpush.bf16.msrb.mxu3 %v2607_v1  ;;  %1442 = vmatpush.bf16.msrb.mxu2 %v2603_v30 }
 0x7a3   :  { %1580 = vmatpush.bf16.msra.mxu1 %v2615_v35  ;;  %1534 = vmatpush.bf16.msra.mxu0 %v2611_v39 }
 0x7a6   :  { %1489 = vmatpush.bf16.msrb.mxu3 %v2606_v29  ;;  %1443 = vmatpush.bf16.msrb.mxu2 %v2602_v32 }
 0x7a7   :  { %1581 = vmatpush.bf16.msra.mxu1 %v2614_v38  ;;  %1535 = vmatpush.bf16.msra.mxu0 %v2610_v40 }
 0x7aa   :  { %1490 = vmatpush.bf16.msrb.mxu3 %v2605_v31  ;;  %1444 = vmatpush.bf16.msrb.mxu2 %v2601_v34 }
 0x7ab   :  { %1582 = vmatpush.bf16.msra.mxu1 %v2613_v13  ;;  %1536 = vmatpush.bf16.msra.mxu0 %v2609_v0 }
 0x7ae   :  { %1491 = vmatpush.bf16.msrb.mxu3 %v2604_v33  ;;  %1445 = vmatpush.bf16.msrb.mxu2 %v2600_v36 }
 0x7af   :  { %1583 = vmatpush.bf16.msra.mxu1 %v2612_v41  ;;  %1537 = vmatpush.bf16.msra.mxu0 %v2608_v44 }
 0x7b0   :  { %2375 = vmatmul.msk.bf16.vlgmr.msra.gmra.mxu2 %vm52_vm0, %v1161_v28  ;;  %2376 = vmatmul.msk.bf16.vlgmr.msra.gmra.mxu3 %vm52_vm0, %v1161_v28 }
 0x7b1   :  { %2393 = vmatmul.msk.bf16.vlgmr.msrb.gmra.mxu0 %vm52_vm0, %v1161_v28  ;;  %2394 = vmatmul.msk.bf16.vlgmr.msrb.gmra.mxu1 %vm52_vm0, %v1161_v28 }
 0x81e   :  { %v1242_v42 = vpop.f32.mrf.mxu0  ;;  %v1256_v43 = vpop.f32.mrf.mxu1 }
 0x81f   :  { %v1359_v47 = vpack.c.bf16 %v1242_v42, %v1242_v42  ;;  %v1367_v48 = vpack.c.bf16 %v1256_v43, %v1256_v43 }
 0x821   :  { %v1619_v52 = vunpack.c.l.b16 %v1359_v47  ;;  %v1454_v54 = vunpack.c.l.b16 %v1367_v48 }
 0x823   :  { %v1194_v45 = vpop.f32.mrf.mxu2  ;;  %v1208_v46 = vpop.f32.mrf.mxu3 }
 0x824   :  { %v1357_v58 = vpack.c.bf16 %v1194_v45, %v1194_v45  ;;  %v1365_v59 = vpack.c.bf16 %v1208_v46, %v1208_v46 }
 0x826   :  { %v1244_v49 = vpop.f32.mrf.mxu0  ;;  %v1258_v2 = vpop.f32.mrf.mxu1  ;;  %v1592_v4 = vunpack.c.l.b16 %v1357_v58  ;;  %v1408_v5 = vunpack.c.l.b16 %v1365_v59 }
 0x827   :  { %v1360_v50 = vpack.c.bf16 %v1244_v49, %v1244_v49  ;;  %v1368_v51 = vpack.c.bf16 %v1258_v2, %v1258_v2 }
 0x829   :  { %v1620_v55 = vunpack.c.l.b16 %v1360_v50  ;;  %v1455_v56 = vunpack.c.l.b16 %v1368_v51 }
 0x82b   :  { %v1621_v60 = vpack.c.b16 %v1620_v55, %v1619_v52  ;;  %v1456_v37 = vpack.c.b16 %v1455_v56, %v1454_v54  ;;  %v1196_v62 = vpop.f32.mrf.mxu2  ;;  %v1210_v63 = vpop.f32.mrf.mxu3 }
 0x82c   :  { %v1358_v18 = vpack.c.bf16 %v1196_v62, %v1196_v62  ;;  %v1366_v3 = vpack.c.bf16 %v1210_v63, %v1210_v63 }
 0x82d   :  { %1622 = vrot.lane.b32.xlu2 %v1621_v60, %s2760_s21  ;;  %2460 = vmatmul.msk.bf16.vlgmr.msrb.gmra.mxu3 %vm409_vm8, %v1456_v37 }
 0x82e   :  { %v1593_v6 = vunpack.c.l.b16 %v1358_v18  ;;  %v1409_v7 = vunpack.c.l.b16 %v1366_v3  ;;  %v1338_v8 = vpop.f32.mrf.mxu0  ;;  %v1352_v11 = vpop.f32.mrf.mxu1 }
 0x82f   :  { %v1363_v12 = vpack.c.bf16 %v1338_v8, %v1338_v8  ;;  %v1371_v17 = vpack.c.bf16 %v1352_v11, %v1352_v11 }
 0x830   :  { %v1594_v14 = vpack.c.b16 %v1593_v6, %v1592_v4  ;;  %v1410_v9 = vpack.c.b16 %v1409_v7, %v1408_v5 }
 0x831   :  { %v1673_v23 = vunpack.c.l.b16 %v1363_v12  ;;  %v1546_v24 = vunpack.c.l.b16 %v1371_v17  ;;  %v2731_v12 = vld [vmem:[%s3444_s1] sm:$0xff] }
 0x832   :  { %2443 = vmatmul.msk.bf16.vlgmr.msrb.gmra.mxu2 %vm409_vm8, %v1410_v9  ;;  %1595 = vrot.lane.b32.xlu0 %v1594_v14, %s2760_s21 }
 0x833   :  { %v1290_v15 = vpop.f32.mrf.mxu2  ;;  %v1304_v16 = vpop.f32.mrf.mxu3 }
 0x834   :  { %v1361_v61 = vpack.c.bf16 %v1290_v15, %v1290_v15  ;;  %v1369_v27 = vpack.c.bf16 %v1304_v16, %v1304_v16 }
 0x836   :  { %v1340_v19 = vpop.f32.mrf.mxu0  ;;  %v1354_v20 = vpop.f32.mrf.mxu1  ;;  %v1646_v33 = vunpack.c.l.b16 %v1361_v61  ;;  %v1500_v34 = vunpack.c.l.b16 %v1369_v27 }
 0x837   :  { %v1364_v21 = vpack.c.bf16 %v1340_v19, %v1340_v19  ;;  %v1372_v22 = vpack.c.bf16 %v1354_v20, %v1354_v20 }
 0x839   :  { %v1674_v25 = vunpack.c.l.b16 %v1364_v21  ;;  %v1547_v26 = vunpack.c.l.b16 %v1372_v22 }
 0x83b   :  { %v1675_v28 = vpack.c.b16 %v1674_v25, %v1673_v23  ;;  %v1548_v1 = vpack.c.b16 %v1547_v26, %v1546_v24  ;;  %v1292_v29 = vpop.f32.mrf.mxu2  ;;  %v1306_v30 = vpop.f32.mrf.mxu3  ;;  %v2732_v24 = vld [vmem:[%s3444_s1 + $0x8] sm:$0xff] }
 0x83c   :  { %v1362_v31 = vpack.c.bf16 %v1292_v29, %v1292_v29  ;;  %v1370_v32 = vpack.c.bf16 %v1306_v30, %v1306_v30 }
 0x83d   :  { %2494 = vmatmul.msk.bf16.vlgmr.msra.gmra.mxu1 %vm409_vm8, %v1548_v1  ;;  %1676 = vrot.lane.b32.xlu0 %v1675_v28, %s2760_s21 }
 0x83e   :  { %v1647_v35 = vunpack.c.l.b16 %v1362_v31  ;;  %v1501_v36 = vunpack.c.l.b16 %v1370_v32 }
 0x840   :  { %v1648_v38 = vpack.c.b16 %v1647_v35, %v1646_v33  ;;  %v1502_v39 = vpack.c.b16 %v1501_v36, %v1500_v34 }
 0x842   :  { %2477 = vmatmul.msk.bf16.vlgmr.msra.gmra.mxu0 %vm409_vm8, %v1502_v39  ;;  %1649 = vrot.lane.b32.xlu1 %v1648_v38, %s2760_s21  ;;  %s2119_s21 = sshll.u32 %s3456_s13, 4  ;;  %s2120_s21 = int_to_ptr.hbm [resolvable:$true] %s2119_s21 }
 0x887   :  { %v1623_v13 = vpop.permute.xlu2 %1622 }
 0x888   :  { %v1628_v40 = vsel %vm409_vm8, %v1623_v13, 0 }
 0x889   :  { %1637 = vmatpush.bf16.xpose.msra.mxu3 %v1628_v40 }
 0x890   :  { %2496 = vmatmul.msk.bf16.vlgmr.msra.gmra.mxu3 %vm409_vm8, %v1621_v60 }
 0x8a4   :  { %v1596_v41 = vpop.permute.xlu0 %1595 }
 0x8a5   :  { %v1601_v0 = vsel %vm409_vm8, %v1596_v41, 0 }
 0x8a6   :  { %1610 = vmatpush.bf16.xpose.msra.mxu2 %v1601_v0 }
 0x8ad   :  { %2495 = vmatmul.msk.bf16.vlgmr.msra.gmra.mxu2 %vm409_vm8, %v1594_v14 }
 0x8af   :  { %v1677_v42 = vpop.permute.xlu0 %1676 }
 0x8b0   :  { %v1682_v43 = vsel %vm409_vm8, %v1677_v42, 0  ;;  %v1493_v44 = vpop.f32.mrf.mxu3 }
 0x8b1   :  { %1691 = vmatpush.bf16.xpose.msrb.mxu1 %v1682_v43  ;;  %v1796_v48 = vpack.c.bf16 %v1493_v44, %v1493_v44 }
 0x8b3   :  { %v1837_v51 = vunpack.c.l.b16 %v1796_v48 }
 0x8b4   :  { %v1650_v45 = vpop.permute.xlu1 %1649 }
 0x8b5   :  { %v1655_v46 = vsel %vm409_vm8, %v1650_v45, 0  ;;  %v1447_v47 = vpop.f32.mrf.mxu2 }
 0x8b6   :  { %1664 = vmatpush.bf16.xpose.msrb.mxu0 %v1655_v46  ;;  %v1794_v54 = vpack.c.bf16 %v1447_v47, %v1447_v47 }
 0x8b8   :  { %v1495_v49 = vpop.f32.mrf.mxu3  ;;  %2498 = vmatmul.msk.bf16.vlgmr.msrb.gmra.mxu1 %vm409_vm8, %v1675_v28  ;;  %v1809_v60 = vunpack.c.l.b16 %v1794_v54 }
 0x8b9   :  { %v1797_v2 = vpack.c.bf16 %v1495_v49, %v1495_v49 }
 0x8ba   :  { %v1585_v50 = vpop.f32.mrf.mxu1 }
 0x8bb   :  { %v1838_v52 = vunpack.c.l.b16 %v1797_v2  ;;  %v1800_v62 = vpack.c.bf16 %v1585_v50, %v1585_v50 }
 0x8bd   :  { %v1839_v55 = vpack.c.b16 %v1838_v52, %v1837_v51  ;;  %v1449_v56 = vpop.f32.mrf.mxu2  ;;  %2497 = vmatmul.msk.bf16.vlgmr.msrb.gmra.mxu0 %vm409_vm8, %v1648_v38  ;;  %v1893_v4 = vunpack.c.l.b16 %v1800_v62 }
 0x8be   :  { %v1795_v58 = vpack.c.bf16 %v1449_v56, %v1449_v56 }
 0x8bf   :  { %1851 = vmatpush.bf16.msrb.mxu3 %v1839_v55  ;;  %v1539_v59 = vpop.f32.mrf.mxu0 }
 0x8c0   :  { %v1810_v37 = vunpack.c.l.b16 %v1795_v58  ;;  %v1798_v6 = vpack.c.bf16 %v1539_v59, %v1539_v59 }
 0x8c2   :  { %v1811_v63 = vpack.c.b16 %v1810_v37, %v1809_v60  ;;  %v1587_v18 = vpop.f32.mrf.mxu1  ;;  %v1865_v14 = vunpack.c.l.b16 %v1798_v6 }
 0x8c3   :  { %v1801_v3 = vpack.c.bf16 %v1587_v18, %v1587_v18 }
 0x8c4   :  { %1823 = vmatpush.bf16.msrb.mxu2 %v1811_v63 }
 0x8c5   :  { %v1894_v5 = vunpack.c.l.b16 %v1801_v3 }
 0x8c7   :  { %v1895_v7 = vpack.c.b16 %v1894_v5, %v1893_v4  ;;  %v1541_v8 = vpop.f32.mrf.mxu0 }
 0x8c8   :  { %v1799_v11 = vpack.c.bf16 %v1541_v8, %v1541_v8 }
 0x8c9   :  { %1907 = vmatpush.bf16.msra.mxu1 %v1895_v7 }
 0x8ca   :  { %v1866_v9 = vunpack.c.l.b16 %v1799_v11 }
 0x8cc   :  { %v1867_v15 = vpack.c.b16 %v1866_v9, %v1865_v14 }
 0x8ce   :  { %1879 = vmatpush.bf16.msra.mxu0 %v1867_v15 }
 0x913   :  { %v1639_v16 = vpop.f32.mrf.mxu3 }
 0x914   :  { %v1640_v17 = vadd.f32 %v2731_v12, %v1639_v16 }
 0x916   :  { %v1704_v19 = vsel %vm673_vm9, %v1640_v17, -inf }
 0x917   :  { %1705 = vmax.xlane.f32.xlu1 %v1704_v19 }
 0x91b   :  { %v1641_v23 = vpop.f32.mrf.mxu3 }
 0x91c   :  { %v1642_v25 = vadd.f32 %v2732_v24, %v1641_v23 }
 0x91e   :  { %v1707_v29 = vsel %vm673_vm9, %v1642_v25, -inf }
 0x930   :  { %v1612_v20 = vpop.f32.mrf.mxu2 }
 0x931   :  { %v1613_v21 = vadd.f32 %v2731_v12, %v1612_v20 }
 0x933   :  { %v1698_v22 = vsel %vm673_vm9, %v1613_v21, -inf }
 0x934   :  { %1699 = vmax.xlane.f32.xlu2 %v1698_v22 }
 0x935   :  { %v1693_v27 = vpop.f32.mrf.mxu1 }
 0x936   :  { %v1694_v30 = vadd.f32 %v2731_v12, %v1693_v27 }
 0x938   :  { %v1614_v26 = vpop.f32.mrf.mxu2  ;;  %v1716_v34 = vsel %vm673_vm9, %v1694_v30, -inf }
 0x939   :  { %v1615_v61 = vadd.f32 %v2732_v24, %v1614_v26 }
 0x93a   :  { %v1666_v28 = vpop.f32.mrf.mxu0 }
 0x93b   :  { %v1701_v1 = vsel %vm673_vm9, %v1615_v61, -inf  ;;  %v1667_v31 = vadd.f32 %v2731_v12, %v1666_v28 }
 0x93c   :  { %1702 = vmax.xlane.f32.xlu0 %v1701_v1  ;;  %1708 = vmax.xlane.f32.xlu2 %v1707_v29 }
 0x93d   :  { %v1710_v35 = vsel %vm673_vm9, %v1667_v31, -inf  ;;  %v1695_v36 = vpop.f32.mrf.mxu1 }
 0x93e   :  { %v1696_v39 = vadd.f32 %v2732_v24, %v1695_v36 }
 0x940   :  { %v1719_v13 = vsel %vm673_vm9, %v1696_v39, -inf }
 0x942   :  { %v1668_v32 = vpop.f32.mrf.mxu0 }
 0x943   :  { %v1669_v33 = vadd.f32 %v2732_v24, %v1668_v32 }
 0x944   :  { %1717 = vmax.xlane.f32.xlu2 %v1716_v34  ;;  %1711 = vmax.xlane.f32.xlu0 %v1710_v35 }
 0x945   :  { %v1713_v38 = vsel %vm673_vm9, %v1669_v33, -inf }
 0x946   :  { %1714 = vmax.xlane.f32.xlu1 %v1713_v38 }
 0x94c   :  { %1720 = vmax.xlane.f32.xlu0 %v1719_v13 }
 0x98a   :  { %v1706_v40 = vpop.xlane.xlu1 %1705 }
 0x98b   :  { %v1724_v41 = vsub.f32 %v1640_v17, %v1706_v40 }
 0x98d   :  { %v1734_v0 = vmul.f32 1.442695, %v1724_v41 }
 0x98f   :  { %2691 = vpow2.f32 %v1734_v0 }
 0x995   :  { %v3359_v42 = vpop.eup %2691 }
 0x996   :  { %v1752_v43 = vsel %vm673_vm9, %v3359_v42, 0.0 }
 0x997   :  { %1753 = vadd.xlane.f32.xlu0 %v1752_v43 }
 0x9a7   :  { %v1700_v44 = vpop.xlane.xlu2 %1699 }
 0x9a8   :  { %v1722_v45 = vsub.f32 %v1613_v21, %v1700_v44 }
 0x9aa   :  { %v1730_v46 = vmul.f32 1.442695, %v1722_v45 }
 0x9ac   :  { %2693 = vpow2.f32 %v1730_v46 }
 0x9af   :  { %v1703_v47 = vpop.xlane.xlu0 %1702  ;;  %v1709_v48 = vpop.xlane.xlu2 %1708 }
 0x9b0   :  { %v1723_v49 = vsub.f32 %v1615_v61, %v1703_v47  ;;  %v1725_v2 = vsub.f32 %v1642_v25, %v1709_v48 }
 0x9b2   :  { %v2694_v50 = vpop.eup %2693  ;;  %v1732_v51 = vmul.f32 1.442695, %v1723_v49  ;;  %v1736_v52 = vmul.f32 1.442695, %v1725_v2 }
 0x9b3   :  { %v1746_v54 = vsel %vm673_vm9, %v2694_v50, 0.0 }
 0x9b4   :  { %2695 = vpow2.f32 %v1732_v51  ;;  %1747 = vadd.xlane.f32.xlu1 %v1746_v54 }
 0x9b5   :  { %2697 = vpow2.f32 %v1736_v52 }
 0x9b7   :  { %v1718_v55 = vpop.xlane.xlu2 %1717  ;;  %v1712_v56 = vpop.xlane.xlu0 %1711 }
 0x9b8   :  { %v1728_v58 = vsub.f32 %v1694_v30, %v1718_v55  ;;  %v1726_v59 = vsub.f32 %v1667_v31, %v1712_v56 }
 0x9b9   :  { %v1715_v60 = vpop.xlane.xlu1 %1714 }
 0x9ba   :  { %v2696_v37 = vpop.eup %2695  ;;  %v1742_v62 = vmul.f32 1.442695, %v1728_v58  ;;  %v1738_v63 = vmul.f32 1.442695, %v1726_v59  ;;  %v1727_v18 = vsub.f32 %v1669_v33, %v1715_v60 }
 0x9bb   :  { %v2698_v3 = vpop.eup %2697  ;;  %v1749_v4 = vsel %vm673_vm9, %v2696_v37, 0.0 }
 0x9bc   :  { %2699 = vpow2.f32 %v1742_v62  ;;  %v1740_v5 = vmul.f32 1.442695, %v1727_v18  ;;  %1750 = vadd.xlane.f32.xlu2 %v1749_v4  ;;  %v1755_v6 = vsel %vm673_vm9, %v2698_v3, 0.0 }
 0x9bd   :  { %2701 = vpow2.f32 %v1738_v63  ;;  %1756 = vadd.xlane.f32.xlu1 %v1755_v6 }
 0x9be   :  { %2703 = vpow2.f32 %v1740_v5 }
 0x9bf   :  { %v1721_v7 = vpop.xlane.xlu0 %1720 }
 0x9c0   :  { %v1729_v8 = vsub.f32 %v1696_v39, %v1721_v7 }
 0x9c2   :  { %v2700_v11 = vpop.eup %2699  ;;  %v1744_v14 = vmul.f32 1.442695, %v1729_v8 }
 0x9c3   :  { %v2702_v9 = vpop.eup %2701  ;;  %v1764_v15 = vsel %vm673_vm9, %v2700_v11, 0.0 }
 0x9c4   :  { %v2704_v16 = vpop.eup %2703  ;;  %2705 = vpow2.f32 %v1744_v14  ;;  %v1758_v12 = vsel %vm673_vm9, %v2702_v9, 0.0 }
 0x9c5   :  { %1765 = vadd.xlane.f32.xlu1 %v1764_v15  ;;  %1759 = vadd.xlane.f32.xlu2 %v1758_v12  ;;  %v1761_v17 = vsel %vm673_vm9, %v2704_v16, 0.0 }
 0x9c6   :  { %1762 = vadd.xlane.f32.xlu0 %v1761_v17  ;;  %v2636_v17 = vld [vmem:[%s3449_s6 + $0x1] ss:$0 sm:$0xff] }
 0x9ca   :  { %v2706_v19 = vpop.eup %2705 }
 0x9cb   :  { %v1767_v20 = vsel %vm673_vm9, %v2706_v19, 0.0 }
 0x9cd   :  { %1768 = vadd.xlane.f32.xlu2 %v1767_v20 }
 0xa0a   :  { %v1754_v22 = vpop.xlane.xlu0 %1753 }
 0xa27   :  { %v1748_v21 = vpop.xlane.xlu1 %1747 }
 0xa28   :  { %2707 = vrcp.f32 %v1748_v21 }
 0xa29   :  { %2709 = vrcp.f32 %v1754_v22 }
 0xa2e   :  { %v2708_v24 = vpop.eup %2707 }
 0xa2f   :  { %v1751_v23 = vpop.xlane.xlu2 %1750  ;;  %v2710_v26 = vpop.eup %2709  ;;  %v1778_v61 = vmul.f32 %v2708_v24, %v2694_v50 }
 0xa30   :  { %2711 = vrcp.f32 %v1751_v23  ;;  %v1757_v25 = vpop.xlane.xlu1 %1756  ;;  %v1780_v27 = vmul.f32 %v2710_v26, %v3359_v42 }
 0xa31   :  { %2713 = vrcp.f32 %v1757_v25  ;;  %v1786_v29 = vpack.c.bf16 %v1778_v61, %v1778_v61 }
 0xa32   :  { %v1788_v31 = vpack.c.bf16 %v1780_v27, %v1780_v27 }
 0xa33   :  { %v1804_v39 = vunpack.c.l.b16 %v1786_v29 }
 0xa34   :  { %v1832_v40 = vunpack.c.l.b16 %v1788_v31 }
 0xa36   :  { %v2712_v28 = vpop.eup %2711 }
 0xa37   :  { %v2714_v1 = vpop.eup %2713  ;;  %v1779_v30 = vmul.f32 %v2712_v28, %v2696_v37 }
 0xa38   :  { %v1781_v32 = vmul.f32 %v2714_v1, %v2698_v3  ;;  %v1760_v33 = vpop.xlane.xlu2 %1759  ;;  %v1766_v34 = vpop.xlane.xlu1 %1765 }
 0xa39   :  { %v1787_v35 = vpack.c.bf16 %v1779_v30, %v1779_v30  ;;  %2715 = vrcp.f32 %v1760_v33  ;;  %v1763_v36 = vpop.xlane.xlu0 %1762 }
 0xa3a   :  { %v1789_v38 = vpack.c.bf16 %v1781_v32, %v1781_v32  ;;  %2717 = vrcp.f32 %v1766_v34 }
 0xa3b   :  { %v1805_v13 = vunpack.c.l.b16 %v1787_v35  ;;  %2719 = vrcp.f32 %v1763_v36 }
 0xa3c   :  { %v1833_v41 = vunpack.c.l.b16 %v1789_v38 }
 0xa3d   :  { %v1806_v0 = vpack.c.b16 %v1805_v13, %v1804_v39  ;;  %v2617_v13 = vld [vmem:[%s3452_s9 + $0x18] sm:$0xff] }
 0xa3e   :  { %v1834_v42 = vpack.c.b16 %v1833_v41, %v1832_v40  ;;  %2027 = vmatpush.bf16.msra.mxu2 %v2617_v13 }
 0xa3f   :  { %v2716_v43 = vpop.eup %2715  ;;  %2499 = vmatmul.msk.bf16.vlgmr.msrb.gmra.mxu2 %vm673_vm9, %v1806_v0 }
 0xa40   :  { %v2718_v44 = vpop.eup %2717  ;;  %v1782_v45 = vmul.f32 %v2716_v43, %v2702_v9  ;;  %v1769_v46 = vpop.xlane.xlu2 %1768  ;;  %2500 = vmatmul.msk.bf16.vlgmr.msrb.gmra.mxu3 %vm673_vm9, %v1834_v42  ;;  %v2616_v42 = vld [vmem:[%s3452_s9 + $0x10] sm:$0xff] }
 0xa41   :  { %v2720_v47 = vpop.eup %2719  ;;  %2721 = vrcp.f32 %v1769_v46  ;;  %v1784_v2 = vmul.f32 %v2718_v44, %v2700_v11 }
 0xa42   :  { %v1790_v48 = vpack.c.bf16 %v1782_v45, %v1782_v45  ;;  %v1783_v49 = vmul.f32 %v2720_v47, %v2704_v16  ;;  %2028 = vmatpush.bf16.msra.mxu2 %v2616_v42 }
 0xa43   :  { %v1792_v55 = vpack.c.bf16 %v1784_v2, %v1784_v2 }
 0xa44   :  { %v1791_v50 = vpack.c.bf16 %v1783_v49, %v1783_v49  ;;  %v1860_v51 = vunpack.c.l.b16 %v1790_v48 }
 0xa45   :  { %v1888_v60 = vunpack.c.l.b16 %v1792_v55 }
 0xa46   :  { %v1861_v52 = vunpack.c.l.b16 %v1791_v50 }
 0xa47   :  { %v2722_v54 = vpop.eup %2721 }
 0xa48   :  { %v1862_v56 = vpack.c.b16 %v1861_v52, %v1860_v51  ;;  %v1785_v58 = vmul.f32 %v2722_v54, %v2706_v19 }
 0xa4a   :  { %v1793_v59 = vpack.c.bf16 %v1785_v58, %v1785_v58  ;;  %2501 = vmatmul.msk.bf16.vlgmr.msra.gmra.mxu0 %vm673_vm9, %v1862_v56 }
 0xa4c   :  { %v1889_v37 = vunpack.c.l.b16 %v1793_v59 }
 0xa4e   :  { %v1890_v62 = vpack.c.b16 %v1889_v37, %v1888_v60 }
 0xa50   :  { %2502 = vmatmul.msk.bf16.vlgmr.msra.gmra.mxu1 %vm673_vm9, %v1890_v62  ;;  %v2638_v62 = vld [vmem:[%s3451_s8 + $0x1] ss:$0 sm:$0xff] }
 0xac2   :  { %v1825_v63 = vpop.f32.mrf.mxu2 }
 0xac3   :  { %v1853_v18 = vpop.f32.mrf.mxu3  ;;  %v1914_v4 = vsel %vm52_vm0, %v1825_v63, 0.0 }
 0xac4   :  { %v1915_v5 = vsel %vm52_vm0, %v1853_v18, 0.0 }
 0xac5   :  { %v1916_v7 = vadd.f32 %v1915_v5, %v1914_v4 }
 0xac7   :  { %v1881_v3 = vpop.f32.mrf.mxu0 }
 0xac8   :  { %v1917_v6 = vsel %vm52_vm0, %v1881_v3, 0.0 }
 0xac9   :  { %v1918_v11 = vadd.f32 %v1917_v6, %v1916_v7  ;;  %v2621_v7 = vld [vmem:[%s3454_s11 + $0x38] sm:$0xff] }
 0xaca   :  { %v1827_v8 = vpop.f32.mrf.mxu2  ;;  %2099 = vmatpush.bf16.msra.mxu3 %v2621_v7 }
 0xacb   :  { %v1855_v14 = vpop.f32.mrf.mxu3  ;;  %v1921_v19 = vsel %vm52_vm0, %v1827_v8, 0.0  ;;  %v2620_v8 = vld [vmem:[%s3454_s11 + $0x30] sm:$0xff] }
 0xacc   :  { %v1922_v20 = vsel %vm52_vm0, %v1855_v14, 0.0  ;;  %v2618_v14 = vld [vmem:[%s3454_s11 + $0x20] sm:$0xff] }
 0xacd   :  { %v1909_v9 = vpop.f32.mrf.mxu1  ;;  %v1923_v23 = vadd.f32 %v1922_v20, %v1921_v19 }
 0xace   :  { %v1919_v15 = vsel %vm52_vm0, %v1909_v9, 0.0  ;;  %2100 = vmatpush.bf16.msra.mxu3 %v2620_v8  ;;  %v2639_v9 = vld [vmem:[%s3453_s10 + $0x1] ss:$0 sm:$0xff] }
 0xacf   :  { %v1920_v16 = vadd.f32 %v1919_v15, %v1918_v11  ;;  %v1883_v12 = vpop.f32.mrf.mxu0  ;;  %v2619_v11 = vld [vmem:[%s3454_s11 + $0x28] sm:$0xff] }
 0xad0   :  { %v1924_v22 = vsel %vm52_vm0, %v1883_v12, 0.0 }
 0xad1   :  { %v1928_v21 = vadd.f32 %v1920_v16, %v3139_v53  ;;  %v1925_v25 = vadd.f32 %v1924_v22, %v1923_v23 }
 0xad2   :  { %2101 = vmatpush.bf16.msra.mxu3 %v2619_v11 }
 0xad3   :  { %v3386_v24 = vadd.f32 %v2636_v17, %v1928_v21 }
 0xad5   :  { %v1911_v26 = vpop.f32.mrf.mxu1  ;;  %v1941_v61 = vsel %vm52_vm0, %v3386_v24, 0.0 }
 0xad6   :  { %v1926_v27 = vsel %vm52_vm0, %v1911_v26, 0.0  ;;  %1942 = vadd.xlane.f32.xlu0 %v1941_v61  ;;  %2102 = vmatpush.bf16.msra.mxu3 %v2618_v14 }
 0xad7   :  { %v1927_v28 = vadd.f32 %v1926_v27, %v1925_v25 }
 0xad9   :  { %v1929_v1 = vadd.f32 %v1927_v28, %v3144_v57 }
 0xadb   :  { %v3392_v29 = vadd.f32 %v2636_v17, %v1929_v1 }
 0xadd   :  { %v1944_v53 = vsel %vm52_vm0, %v3392_v29, 0.0 }
 0xade   :  { %1945 = vadd.xlane.f32.xlu1 %v1944_v53 }
 0xb49   :  { %v1943_v30 = vpop.xlane.xlu0 %1942 }
 0xb4a   :  { %v1947_v31 = vmul.f32 %v1943_v30, %v2848_v10 }
 0xb4c   :  { %v1949_v32 = vsub.f32 %v3386_v24, %v1947_v31 }
 0xb4e   :  { %v1951_v33 = vmul.f32 %v1949_v32, %v1949_v32 }
 0xb50   :  { %v1953_v34 = vsel %vm52_vm0, %v1951_v33, 0.0 }
 0xb51   :  { %1954 = vadd.xlane.f32.xlu2 %v1953_v34  ;;  %v1946_v35 = vpop.xlane.xlu1 %1945 }
 0xb52   :  { %v1948_v36 = vmul.f32 %v1946_v35, %v2848_v10 }
 0xb54   :  { %v1950_v57 = vsub.f32 %v3392_v29, %v1948_v36 }
 0xb56   :  { %v1952_v38 = vmul.f32 %v1950_v57, %v1950_v57 }
 0xb58   :  { %v1956_v39 = vsel %vm52_vm0, %v1952_v38, 0.0 }
 0xb59   :  { %1957 = vadd.xlane.f32.xlu0 %v1956_v39 }
 0xbc4   :  { %v1955_v40 = vpop.xlane.xlu2 %1954 }
 0xbc5   :  { %v1959_v41 = vmul.f32 %v1955_v40, %v2848_v10 }
 0xbc7   :  { %v1961_v0 = vadd.f32 1e-05, %v1959_v41 }
 0xbc9   :  { %2723 = vrsqrt.f32 %v1961_v0  ;;  %vm1969_vm9 = vweird.f32 %v1961_v0 }
 0xbcc   :  { %v1958_v43 = vpop.xlane.xlu0 %1957 }
 0xbcd   :  { %v1960_v44 = vmul.f32 %v1958_v43, %v2848_v10  ;;  %v2637_v10 = vld [vmem:[%s3450_s7 + $0x1] ss:$0 sm:$0xff] }
 0xbcf   :  { %v2724_v45 = vpop.eup %2723  ;;  %v1962_v46 = vadd.f32 1e-05, %v1960_v44 }
 0xbd0   :  { %v1964_v47 = vmul.f32 %v2724_v45, %v1961_v0  ;;  %vm1970_vm7 = vweird.f32 %v2724_v45 }
 0xbd1   :  { %2725 = vrsqrt.f32 %v1962_v46  ;;  %vm1971_vm10 = vmor %vm1969_vm9, %vm1970_vm7  ;;  %vm1979_vm12 = vweird.f32 %v1962_v46 }
 0xbd2   :  { %v1965_v48 = vmul.f32 %v2724_v45, %v1964_v47 }
 0xbd4   :  { %v1966_v49 = vmul.f32 0.5, %v1965_v48 }
 0xbd6   :  { %v1967_v2 = vsub.f32 1.5, %v1966_v49 }
 0xbd7   :  { %v2726_v50 = vpop.eup %2725 }
 0xbd8   :  { %v1968_v51 = vmul.f32 %v2724_v45, %v1967_v2  ;;  %v1974_v52 = vmul.f32 %v2726_v50, %v1962_v46  ;;  %vm1980_vm11 = vweird.f32 %v2726_v50 }
 0xbd9   :  { %vm1981_vm13 = vmor %vm1979_vm12, %vm1980_vm11 }
 0xbda   :  { %v1975_v54 = vmul.f32 %v2726_v50, %v1974_v52  ;;  %v1972_v55 = vsel %vm1971_vm10, %v2724_v45, %v1968_v51 }
 0xbdb   :  { %v1983_v59 = vmul.f32 %v1972_v55, %v1949_v32 }
 0xbdc   :  { %v1976_v56 = vmul.f32 0.5, %v1975_v54 }
 0xbdd   :  { %v1988_v63 = vmul.f32 %v2637_v10, %v1983_v59 }
 0xbde   :  { %v1977_v58 = vsub.f32 1.5, %v1976_v56 }
 0xbdf   :  { %v1993_v4 = vadd.f32 %v2638_v62, %v1988_v63 }
 0xbe0   :  { %v1978_v60 = vmul.f32 %v2726_v50, %v1977_v58 }
 0xbe2   :  { %v1982_v37 = vsel %vm1981_vm13, %v2726_v50, %v1978_v60 }
 0xbe3   :  { %v1984_v18 = vmul.f32 %v1982_v37, %v1950_v57  ;;  %v2640_v57 = vld [vmem:[%s3455_s12 + $0x1] ss:$0 sm:$0xff]  ;;  %s2762_s12 = smov 128  }
 0xbe5   :  { %v1989_v3 = vmul.f32 %v2637_v10, %v1984_v18 }
 0xbe7   :  { %v1994_v5 = vadd.f32 %v2638_v62, %v1989_v3 }
 0xbe9   :  { %v1995_v6 = vpack.c.bf16 %v1994_v5, %v1993_v4 }
 0xbeb   :  { %2519 = vmatmul.msk.bf16.vlgmr.msra.gmra.mxu2 %vm52_vm0, %v1995_v6 }
 0xc6e   :  { %v2030_v15 = vpop.f32.mrf.mxu2 }
 0xc6f   :  { %v2031_v16 = vadd.f32 %v2639_v9, %v2030_v15 }
 0xc71   :  { %v2037_v12 = vmul.f32 0.044715, %v2031_v16  ;;  %v2035_v31 = vmul.f32 0.5, %v2031_v16 }
 0xc73   :  { %v2039_v17 = vmul.f32 %v2037_v12, %v2031_v16 }
 0xc75   :  { %v2041_v19 = vmul.f32 %v2039_v17, %v2031_v16 }
 0xc76   :  { %v2032_v20 = vpop.f32.mrf.mxu2 }
 0xc77   :  { %v2043_v21 = vadd.f32 %v2041_v19, %v2031_v16  ;;  %v2033_v22 = vadd.f32 %v2639_v9, %v2032_v20 }
 0xc79   :  { %v2038_v23 = vmul.f32 0.044715, %v2033_v22  ;;  %v2045_v25 = vmul.f32 0.7978846, %v2043_v21  ;;  %v2036_v32 = vmul.f32 0.5, %v2033_v22 }
 0xc7b   :  { %v2040_v26 = vmul.f32 %v2038_v23, %v2033_v22  ;;  %2727 = vtanh.f32 %v2045_v25 }
 0xc7d   :  { %v2042_v61 = vmul.f32 %v2040_v26, %v2033_v22 }
 0xc7f   :  { %v2044_v27 = vadd.f32 %v2042_v61, %v2033_v22 }
 0xc81   :  { %v2046_v28 = vmul.f32 0.7978846, %v2044_v27  ;;  %v2728_v1 = vpop.eup %2727 }
 0xc82   :  { %v2049_v53 = vadd.f32 1.0, %v2728_v1 }
 0xc83   :  { %2729 = vtanh.f32 %v2046_v28 }
 0xc84   :  { %v2051_v34 = vmul.f32 %v2049_v53, %v2035_v31 }
 0xc89   :  { %v2730_v30 = vpop.eup %2729 }
 0xc8a   :  { %v2050_v33 = vadd.f32 1.0, %v2730_v30 }
 0xc8c   :  { %v2052_v35 = vmul.f32 %v2050_v33, %v2036_v32 }
 0xc8e   :  { %v2053_v36 = vpack.c.bf16 %v2052_v35, %v2051_v34 }
 0xc90   :  { %2545 = vmatmul.msk.bf16.vlgmr.msra.gmra.mxu3 %vm409_vm8, %v2053_v36 }
 0xd13   :  { %v2104_v38 = vpop.f32.mrf.mxu3 }
 0xd14   :  { %v2105_v39 = vadd.f32 %v2640_v57, %v2104_v38 }
 0xd16   :  { %v2109_v13 = vadd.f32 %v2105_v39, %v3386_v24 }
 0xd18   :  { %2111 = vst.msk [vmem:[#allocation2] sm:$0xff] %vm52_vm0, %v2109_v13 }
 0xd1b   :  { %v2106_v40 = vpop.f32.mrf.mxu3 }
 0xd1c   :  { %v2107_v41 = vadd.f32 %v2640_v57, %v2106_v40 }
 0xd1e   :  { %v2110_v0 = vadd.f32 %v2107_v41, %v3392_v29 }
 0xd20   :  { %2112 = vst.msk [vmem:[#allocation2 + $0x8] sm:$0xff] %vm52_vm0, %v2110_v0 }
 0xd21   :  { %2125 = dma.vmem_to_hbm [thread:$0]  %s2118_s20, 256, %s2120_s21, [#allocation3], %s2762_s12, %s2762_s12, %s2763_s23  }
 0xd22   :  { %2757 = dma.done.wait [#allocation3], 256  }
 0xd23   :  { %2758 = vsyncadd [#allocation3], 4294967040 }
 0xd24   :  { %2130 = vsyncpa [#allocation3], 1 }

</bundles_post_ra>
